<compile_context>
chip_gen: v7x
topology: tpu7x:2x2x1
jax: 0.10.0
libtpu: 0.0.40
codegen_flags: <defaults>
</compile_context>

<pallas_src>
import jax
import jax.numpy as jnp
from jax.experimental import pallas as pl
from jax.experimental.pallas import tpu as pltpu


# ---------------------------------------------------------------------------
# Fused encoder kernel: bidirectional GRU (all layers) + multi-head attention
# + L2 normalize, all in one pallas_call.
# ---------------------------------------------------------------------------
def make_encoder_kernel(T, Bp, H, heads, num_layers):
    D = 2 * H  # bidirectional feature size (attention in_size)

    def kernel(*refs):
        xcat_ref = refs[0]      # (T*Bp, 2*E)   row t*Bp+b = [x(t,b) | x(T-1-t,b)]
        mrow_ref = refs[1]      # (T*Bp, 2H)    cols 0:H -> valid[t], H:2H -> valid[T-1-t]
        pos = 2
        layer_refs = []
        for _ in range(num_layers):
            layer_refs.append(refs[pos:pos + 4])   # wih_bd, bih_cat, whh_bd, bhh_cat
            pos += 4
        wh_ref, bh_ref, wo_ref, bo_ref = refs[pos:pos + 4]
        out_ref = refs[pos + 4]                    # (Bp, heads*D) -- 128-lane-dense
        gi_ref = refs[pos + 5]                     # VMEM scratch (3, T*Bp, 2H)
        seq_ref = refs[pos + 6]                    # VMEM scratch (T*Bp, 2H), real time order
        xcat2_ref = refs[pos + 7] if num_layers > 1 else None   # (T*Bp, 4H)

        def run_layer(src_ref, wih_ref, bih_ref, whh_ref, bhh_ref):
            # ---- hoisted per-gate input projections for the whole sequence ----
            # One (T*Bp, 2*in) x (2*in, 2H) matmul per gate; the block-diagonal
            # weight keeps fwd (cols 0:H) and bwd (cols H:2H) separate and the
            # rows are already in step order -> no per-step lane concats.
            xc = src_ref[...]
            for g in range(3):
                gi_ref[g, :, :] = (
                    jnp.dot(xc, wih_ref[g], preferred_element_type=jnp.float32)
                    + bih_ref[g])

            # gate views into the scratch slab (zero-cost ref views)
            gi_r, gi_z, gi_n = gi_ref.at[0], gi_ref.at[1], gi_ref.at[2]

            # Hidden weights / biases read once (stay resident in vregs; ~27
            # vregs pinned + per-step transients stays comfortably under 64).
            w_r, w_z, w_n = whh_ref[0], whh_ref[1], whh_ref[2]   # (2H, 2H) block-diag
            b_r, b_z, b_n = bhh_ref[0], bhh_ref[1], bhh_ref[2]   # (1, 2H)

            # ---- fused fwd+bwd recurrence, h in registers, lazy per-step slices
            h = jnp.zeros((Bp, D), jnp.float32)
            for t in range(T):
                r0, r1 = t * Bp, (t + 1) * Bp              # sublane-aligned (Bp = 8)
                mt = mrow_ref[r0:r1, :] > 0.5              # (Bp, 2H) bool
                ghr = jnp.dot(h, w_r, preferred_element_type=jnp.float32) + b_r
                ghz = jnp.dot(h, w_z, preferred_element_type=jnp.float32) + b_z
                ghn = jnp.dot(h, w_n, preferred_element_type=jnp.float32) + b_n
                r = jax.nn.sigmoid(gi_r[r0:r1, :] + ghr)
                z = jax.nn.sigmoid(gi_z[r0:r1, :] + ghz)
                n = jnp.tanh(gi_n[r0:r1, :] + r * ghn)
                h_new = n + z * (h - n)                    # == (1-z)*n + z*h
                out_t = jnp.where(mt, h_new, 0.0)          # zero padded outputs
                # Scatter to real-time order: fwd half (input time t) -> row
                # block t; bwd half (input time T-1-t) -> row block T-1-t.
                s0 = (T - 1 - t) * Bp
                seq_ref[r0:r1, 0:H] = out_t[:, 0:H]
                seq_ref[s0:s0 + Bp, H:D] = out_t[:, H:D]
                h = jnp.where(mt, h_new, h)                # freeze h on padded steps

        # layer 0 reads the embedded input slab
        run_layer(xcat_ref, *layer_refs[0])

        # deeper layers (not exercised by the num_layers=1 test config)
        for l in range(1, num_layers):
            for t in range(T):
                r0, r1 = t * Bp, (t + 1) * Bp
                s0 = (T - 1 - t) * Bp
                xcat2_ref[r0:r1, 0:D] = seq_ref[r0:r1, :]          # x(t)
                xcat2_ref[r0:r1, D:2 * D] = seq_ref[s0:s0 + Bp, :]  # x(T-1-t)
            run_layer(xcat2_ref, *layer_refs[l])

        # ---- multi-head additive attention (heads packed, block-diag Wo) -----
        x = seq_ref[...]                                             # (T*Bp, D)
        hid = jnp.tanh(jnp.dot(x, wh_ref[...],
                               preferred_element_type=jnp.float32) + bh_ref[...])
        score = jnp.dot(hid, wo_ref[...],
                        preferred_element_type=jnp.float32) + bo_ref[...]  # (T*Bp, heads*D)
        xt = jnp.concatenate([x] * heads, axis=-1)      # ONE lane concat, (T*Bp, heads*D)

        # softmax over time + weighted sum; per-t slices are aligned vreg
        # selects (Bp = 8) and only smax/den/acc stay live across the loop.
        smax = score[0:Bp, :]
        for t in range(1, T):
            smax = jnp.maximum(smax, score[t * Bp:(t + 1) * Bp, :])
        den = jnp.zeros((Bp, heads * D), jnp.float32)
        acc = jnp.zeros((Bp, heads * D), jnp.float32)
        for t in range(T):
            e = jnp.exp(score[t * Bp:(t + 1) * Bp, :] - smax)
            den = den + e
            acc = acc + e * xt[t * Bp:(t + 1) * Bp, :]
        cat = acc / den                                   # = sum_t softmax_t(score) * x_t

        # F.normalize(p=2, dim=1)
        nrm = jnp.sqrt(jnp.sum(cat * cat, axis=1, keepdims=True))
        out_ref[...] = cat / jnp.maximum(nrm, 1e-12)

    return kernel


def run_encoder(xcat, mrow, packed, T, Bp, H):
    gru = packed["gru"]
    att = packed["att"]
    num_layers = len(gru)
    D = 2 * H
    heads = att["wo"].shape[1] // D

    args = [xcat, mrow]
    for lp in gru:
        args += [lp["wih_bd"], lp["bih_cat"], lp["whh_bd"], lp["bhh_cat"]]
    args += [att["wh"], att["bh"], att["wo"], att["bo"]]

    scratch = [pltpu.VMEM((3, T * Bp, D), jnp.float32),   # hoisted gate projections
               pltpu.VMEM((T * Bp, D), jnp.float32)]      # layer output, real time order
    if num_layers > 1:
        scratch.append(pltpu.VMEM((T * Bp, 2 * D), jnp.float32))

    kernel = make_encoder_kernel(T, Bp, H, heads, num_layers)
    return pl.pallas_call(
        kernel,
        out_shape=jax.ShapeDtypeStruct((Bp, heads * D), jnp.float32),
        in_specs=[pl.BlockSpec(memory_space=pltpu.MemorySpace.VMEM)] * len(args),
        out_specs=pl.BlockSpec(memory_space=pltpu.MemorySpace.VMEM),
        scratch_shapes=scratch,
    )(*args)


# ---------------------------------------------------------------------------
# Forward pass (glue: embedding gather + batch pad + time-major slab build).
# Embedding gather stays outside the kernel per the review (tiny HBM traffic).
# ---------------------------------------------------------------------------
def text_rnn_encoder_forward(packed, ids, lengths):
    emb = jnp.take(packed["embed"], ids, axis=0)                  # (B, T, E)
    B, T, E = emb.shape
    H = packed["gru"][0]["whh_bd"].shape[-1] // 2
    Bp = ((B + 7) // 8) * 8                                       # pad batch to sublane multiple

    emb_p = jnp.pad(emb, ((0, Bp - B), (0, 0), (0, 0)))           # dead rows -> zeros
    valid = (jnp.arange(T)[:, None] < lengths[None, :]).astype(jnp.float32)   # (T, B)
    valid_p = jnp.pad(valid, ((0, 0), (0, Bp - B)))               # dead rows -> mask 0

    # [x(t) | x(T-1-t)] time-major slab: row index = t*Bp + b
    xt = jnp.transpose(emb_p, (1, 0, 2))                          # (T, Bp, E)
    xcat = jnp.concatenate([xt, xt[::-1]], axis=-1).reshape(T * Bp, 2 * E)

    # freeze/output mask rows: fwd cols use valid[t], bwd cols valid[T-1-t]
    m_f = jnp.broadcast_to(valid_p[:, :, None], (T, Bp, H))
    m_b = jnp.broadcast_to(valid_p[::-1, :, None], (T, Bp, H))
    mrow = jnp.concatenate([m_f, m_b], axis=-1).reshape(T * Bp, 2 * H)

    out = run_encoder(xcat, mrow, packed, T, Bp, H)
    return out[:B]


# ---------------------------------------------------------------------------
# Parameter init (raw, PyTorch-like layout) + packing into kernel layout.
# ---------------------------------------------------------------------------
def init_params(key, *, num_chars, embed_dim, hidden, num_layers,
                bidirectional, att_hidden, heads, padding_idx):
    assert bidirectional, "fused kernel implements the bidirectional config"
    k_embed, k_gru, k_att = jax.random.split(key, 3)
    params = {}

    embed = jax.random.normal(k_embed, (num_chars, embed_dim), jnp.float32)
    embed = embed.at[padding_idx].set(0.0)                        # nn.Embedding padding_idx
    params["embed"] = embed

    bound = 1.0 / jnp.sqrt(jnp.float32(hidden))

    def gru_dir_params(k, in_size):
        k1, k2, k3, k4 = jax.random.split(k, 4)
        u = lambda kk, shp: jax.random.uniform(kk, shp, jnp.float32, -bound, bound)
        # gate leading axis, order (r, z, n); weights stored input-major (in, H)
        return {"wih": u(k1, (3, in_size, hidden)),
                "whh": u(k2, (3, hidden, hidden)),
                "bih": u(k3, (3, 1, hidden)),
                "bhh": u(k4, (3, 1, hidden))}

    gru_layers = []
    gk = k_gru
    for layer in range(num_layers):
        in_size = embed_dim if layer == 0 else 2 * hidden
        gk, kf, kb = jax.random.split(gk, 3)
        gru_layers.append({"fwd": gru_dir_params(kf, in_size),
                           "bwd": gru_dir_params(kb, in_size)})
    params["gru"] = gru_layers

    att_in = 2 * hidden
    ka1, ka2, ka3, ka4 = jax.random.split(k_att, 4)
    s = 0.1
    params["att"] = {
        "wh": s * jax.random.normal(ka1, (heads, att_in, att_hidden), jnp.float32),
        "bh": s * jax.random.normal(ka2, (heads, 1, att_hidden), jnp.float32),
        "wo": s * jax.random.normal(ka3, (heads, att_hidden, att_in), jnp.float32),
        "bo": s * jax.random.normal(ka4, (heads, 1, att_in), jnp.float32),
    }
    return params


def _block_diag(mats):
    rows = sum(m.shape[0] for m in mats)
    cols = sum(m.shape[1] for m in mats)
    out = jnp.zeros((rows, cols), mats[0].dtype)
    r = c = 0
    for mm in mats:
        out = out.at[r:r + mm.shape[0], c:c + mm.shape[1]].set(mm)
        r += mm.shape[0]
        c += mm.shape[1]
    return out


def pack_params(raw):
    packed = {"embed": raw["embed"], "gru": [], "att": None}
    for layer in raw["gru"]:
        f, b = layer["fwd"], layer["bwd"]
        # per-gate block-diagonal fwd|bwd weights: input (2*in,), output (2H,)
        wih_bd = jnp.stack([_block_diag([f["wih"][g], b["wih"][g]]) for g in range(3)])
        whh_bd = jnp.stack([_block_diag([f["whh"][g], b["whh"][g]]) for g in range(3)])
        bih_cat = jnp.concatenate([f["bih"], b["bih"]], axis=-1)        # (3, 1, 2H)
        bhh_cat = jnp.concatenate([f["bhh"], b["bhh"]], axis=-1)        # (3, 1, 2H)
        packed["gru"].append({"wih_bd": wih_bd, "bih_cat": bih_cat,
                              "whh_bd": whh_bd, "bhh_cat": bhh_cat})
    att = raw["att"]
    heads = att["wh"].shape[0]
    packed["att"] = {
        "wh": jnp.concatenate([att["wh"][h] for h in range(heads)], axis=1),  # (D, heads*A)
        "bh": jnp.concatenate([att["bh"][h] for h in range(heads)], axis=1),  # (1, heads*A)
        "wo": _block_diag([att["wo"][h] for h in range(heads)]),              # (heads*A, heads*D)
        "bo": jnp.concatenate([att["bo"][h] for h in range(heads)], axis=1),  # (1, heads*D)
    }
    return packed


# ---------------------------------------------------------------------------
# Pure-JAX reference (unfused, per-direction / per-head) for a numerical check.
# ---------------------------------------------------------------------------
def reference_forward(raw, ids, lengths):
    emb = jnp.take(raw["embed"], ids, axis=0)                       # (B, T, E)
    B, T, _ = emb.shape
    valid = (jnp.arange(T)[None, :] < lengths[:, None]).astype(jnp.float32)  # (B, T)

    def run_dir(x_bt, mask_bt, p):
        Hh = p["whh"].shape[-1]
        h = jnp.zeros((B, Hh), jnp.float32)
        outs = []
        for t in range(T):
            xt = x_bt[:, t, :]
            mt = mask_bt[:, t][:, None]
            gi = [xt @ p["wih"][g] + p["bih"][g] for g in range(3)]
            gh = [h @ p["whh"][g] + p["bhh"][g] for g in range(3)]
            r = jax.nn.sigmoid(gi[0] + gh[0])
            z = jax.nn.sigmoid(gi[1] + gh[1])
            n = jnp.tanh(gi[2] + r * gh[2])
            h_new = (1.0 - z) * n + z * h
            h = mt * h_new + (1.0 - mt) * h
            outs.append(mt * h_new)
        return jnp.stack(outs, axis=1)                              # (B, T, H)

    x = emb
    for layer in raw["gru"]:
        fwd = run_dir(x, valid, layer["fwd"])
        bwd = jnp.flip(run_dir(jnp.flip(x, 1), jnp.flip(valid, 1), layer["bwd"]), 1)
        x = jnp.concatenate([fwd, bwd], axis=-1)

    att = raw["att"]
    heads = att["wh"].shape[0]
    D = x.shape[-1]
    x2 = x.reshape(B * T, D)
    outs = []
    for h in range(heads):
        hid = jnp.tanh(x2 @ att["wh"][h] + att["bh"][h])
        sc = (hid @ att["wo"][h] + att["bo"][h]).reshape(B, T, D)
        alpha = jax.nn.softmax(sc, axis=1)
        outs.append(jnp.sum(alpha * x, axis=1))
    cat = jnp.concatenate(outs, axis=1)
    nrm = jnp.sqrt(jnp.sum(cat * cat, axis=1, keepdims=True))
    return cat / jnp.maximum(nrm, 1e-12)


if __name__ == "__main__":
    # config: embed{num_chars=20, embedding_dim=32, padding_idx=0},
    #         rnn{input_size=32, hidden_size=32, num_layers=1, bidirectional=True},
    #         att{in_size=64, hidden_size=32, heads=2}
    B, T = 2, 8
    NUM_CHARS, E, H, LAYERS, HEADS, ATT_H = 20, 32, 32, 1, 2, 32
    PAD = 0

    key = jax.random.PRNGKey(0)
    k_param, k_ids = jax.random.split(key)

    raw = init_params(k_param, num_chars=NUM_CHARS, embed_dim=E, hidden=H,
                      num_layers=LAYERS, bidirectional=True,
                      att_hidden=ATT_H, heads=HEADS, padding_idx=PAD)
    packed = pack_params(raw)

    lengths = jnp.array([8, 6], dtype=jnp.int32)   # sorted desc (pack_padded_sequence)
    ids = jax.random.randint(k_ids, (B, T), 1, NUM_CHARS, dtype=jnp.int32)
    pad_mask = jnp.arange(T)[None, :] < lengths[:, None]
    ids = jnp.where(pad_mask, ids, PAD)

    out = jax.jit(text_rnn_encoder_forward)(packed, ids, lengths)
    out = jax.block_until_ready(out)

    assert out.shape == (B, HEADS * 2 * H), out.shape
    assert bool(jnp.all(jnp.isfinite(out)))
    # each row is L2-normalized over dim 1
    assert bool(jnp.allclose(jnp.linalg.norm(out, axis=1), 1.0, atol=1e-4))

    # numerical check vs. unfused pure-JAX reference
    with jax.default_matmul_precision("float32"):
        ref = reference_forward(raw, ids, lengths)
    assert bool(jnp.allclose(out, ref, atol=1e-3, rtol=1e-3)), float(jnp.max(jnp.abs(out - ref)))

    print("KERNEL_OK")
</pallas_src>

<mosaic_0001>
module attributes {stable_mosaic.version = 11 : i64} {
  func.func @kernel(%arg0: memref<64x64xf32, #tpu.memory_space<vmem>>, %arg1: memref<64x64xf32, #tpu.memory_space<vmem>>, %arg2: memref<3x64x64xf32, #tpu.memory_space<vmem>>, %arg3: memref<3x1x64xf32, #tpu.memory_space<vmem>>, %arg4: memref<3x64x64xf32, #tpu.memory_space<vmem>>, %arg5: memref<3x1x64xf32, #tpu.memory_space<vmem>>, %arg6: memref<64x64xf32, #tpu.memory_space<vmem>>, %arg7: memref<1x64xf32, #tpu.memory_space<vmem>>, %arg8: memref<64x128xf32, #tpu.memory_space<vmem>>, %arg9: memref<1x128xf32, #tpu.memory_space<vmem>>, %arg10: memref<8x128xf32, #tpu.memory_space<vmem>>, %arg11: memref<3x64x64xf32, #tpu.memory_space<vmem>>, %arg12: memref<64x64xf32, #tpu.memory_space<vmem>>) attributes {dimension_semantics = [], scalar_prefetch = 0 : i64, scratch_operands = 2 : i64, tpu.core_type = #tpu.core_type<tc>} {
    %c0 = arith.constant 0 : index
    %c0_0 = arith.constant 0 : index
    %0 = vector.load %arg0[%c0, %c0_0] : memref<64x64xf32, #tpu.memory_space<vmem>>, vector<64x64xf32>
    %c0_1 = arith.constant 0 : index
    %c0_2 = arith.constant 0 : index
    %c0_3 = arith.constant 0 : index
    %1 = vector.load %arg2[%c0_1, %c0_2, %c0_3] : memref<3x64x64xf32, #tpu.memory_space<vmem>>, vector<1x64x64xf32>
    %2 = vector.shape_cast %1 : vector<1x64x64xf32> to vector<64x64xf32>
    %cst = arith.constant dense<0.000000e+00> : vector<64x64xf32>
    %3 = tpu.matmul %0, %2, %cst {dimension_numbers = #tpu.dot_dimension_numbers<[1], [0], [0], [1], [0, 0, 1, 1], [], []>} : vector<64x64xf32>, vector<64x64xf32>, vector<64x64xf32> -> vector<64x64xf32>
    %c0_4 = arith.constant 0 : index
    %c0_5 = arith.constant 0 : index
    %c0_6 = arith.constant 0 : index
    %4 = vector.load %arg3[%c0_4, %c0_5, %c0_6] : memref<3x1x64xf32, #tpu.memory_space<vmem>>, vector<1x1x64xf32>
    %5 = vector.shape_cast %4 : vector<1x1x64xf32> to vector<1x64xf32>
    %6 = vector.broadcast %5 : vector<1x64xf32> to vector<64x64xf32>
    %7 = arith.addf %3, %6 : vector<64x64xf32>
    %c0_7 = arith.constant 0 : index
    %c0_8 = arith.constant 0 : index
    %c0_9 = arith.constant 0 : index
    %8 = vector.load %arg11[%c0_7, %c0_8, %c0_9] : memref<3x64x64xf32, #tpu.memory_space<vmem>>, vector<1x64x64xf32>
    %9 = vector.shape_cast %8 : vector<1x64x64xf32> to vector<64x64xf32>
    %10 = vector.shape_cast %7 : vector<64x64xf32> to vector<1x64x64xf32>
    tpu.vector_store %arg11[%c0_7, %c0_8, %c0_9], %10 {strides = array<i32>} : memref<3x64x64xf32, #tpu.memory_space<vmem>>, vector<1x64x64xf32>,
    %c1 = arith.constant 1 : index
    %c0_10 = arith.constant 0 : index
    %c0_11 = arith.constant 0 : index
    %11 = vector.load %arg2[%c1, %c0_10, %c0_11] : memref<3x64x64xf32, #tpu.memory_space<vmem>>, vector<1x64x64xf32>
    %12 = vector.shape_cast %11 : vector<1x64x64xf32> to vector<64x64xf32>
    %cst_12 = arith.constant dense<0.000000e+00> : vector<64x64xf32>
    %13 = tpu.matmul %0, %12, %cst_12 {dimension_numbers = #tpu.dot_dimension_numbers<[1], [0], [0], [1], [0, 0, 1, 1], [], []>} : vector<64x64xf32>, vector<64x64xf32>, vector<64x64xf32> -> vector<64x64xf32>
    %c1_13 = arith.constant 1 : index
    %c0_14 = arith.constant 0 : index
    %c0_15 = arith.constant 0 : index
    %14 = vector.load %arg3[%c1_13, %c0_14, %c0_15] : memref<3x1x64xf32, #tpu.memory_space<vmem>>, vector<1x1x64xf32>
    %15 = vector.shape_cast %14 : vector<1x1x64xf32> to vector<1x64xf32>
    %16 = vector.broadcast %15 : vector<1x64xf32> to vector<64x64xf32>
    %17 = arith.addf %13, %16 : vector<64x64xf32>
    %c1_16 = arith.constant 1 : index
    %c0_17 = arith.constant 0 : index
    %c0_18 = arith.constant 0 : index
    %18 = vector.load %arg11[%c1_16, %c0_17, %c0_18] : memref<3x64x64xf32, #tpu.memory_space<vmem>>, vector<1x64x64xf32>
    %19 = vector.shape_cast %18 : vector<1x64x64xf32> to vector<64x64xf32>
    %20 = vector.shape_cast %17 : vector<64x64xf32> to vector<1x64x64xf32>
    tpu.vector_store %arg11[%c1_16, %c0_17, %c0_18], %20 {strides = array<i32>} : memref<3x64x64xf32, #tpu.memory_space<vmem>>, vector<1x64x64xf32>,
    %c2 = arith.constant 2 : index
    %c0_19 = arith.constant 0 : index
    %c0_20 = arith.constant 0 : index
    %21 = vector.load %arg2[%c2, %c0_19, %c0_20] : memref<3x64x64xf32, #tpu.memory_space<vmem>>, vector<1x64x64xf32>
    %22 = vector.shape_cast %21 : vector<1x64x64xf32> to vector<64x64xf32>
    %cst_21 = arith.constant dense<0.000000e+00> : vector<64x64xf32>
    %23 = tpu.matmul %0, %22, %cst_21 {dimension_numbers = #tpu.dot_dimension_numbers<[1], [0], [0], [1], [0, 0, 1, 1], [], []>} : vector<64x64xf32>, vector<64x64xf32>, vector<64x64xf32> -> vector<64x64xf32>
    %c2_22 = arith.constant 2 : index
    %c0_23 = arith.constant 0 : index
    %c0_24 = arith.constant 0 : index
    %24 = vector.load %arg3[%c2_22, %c0_23, %c0_24] : memref<3x1x64xf32, #tpu.memory_space<vmem>>, vector<1x1x64xf32>
    %25 = vector.shape_cast %24 : vector<1x1x64xf32> to vector<1x64xf32>
    %26 = vector.broadcast %25 : vector<1x64xf32> to vector<64x64xf32>
    %27 = arith.addf %23, %26 : vector<64x64xf32>
    %c2_25 = arith.constant 2 : index
    %c0_26 = arith.constant 0 : index
    %c0_27 = arith.constant 0 : index
    %28 = vector.load %arg11[%c2_25, %c0_26, %c0_27] : memref<3x64x64xf32, #tpu.memory_space<vmem>>, vector<1x64x64xf32>
    %29 = vector.shape_cast %28 : vector<1x64x64xf32> to vector<64x64xf32>
    %30 = vector.shape_cast %27 : vector<64x64xf32> to vector<1x64x64xf32>
    tpu.vector_store %arg11[%c2_25, %c0_26, %c0_27], %30 {strides = array<i32>} : memref<3x64x64xf32, #tpu.memory_space<vmem>>, vector<1x64x64xf32>,
    %c0_28 = arith.constant 0 : index
    %c0_29 = arith.constant 0 : index
    %c0_30 = arith.constant 0 : index
    %31 = vector.load %arg4[%c0_28, %c0_29, %c0_30] : memref<3x64x64xf32, #tpu.memory_space<vmem>>, vector<1x64x64xf32>
    %32 = vector.shape_cast %31 : vector<1x64x64xf32> to vector<64x64xf32>
    %c1_31 = arith.constant 1 : index
    %c0_32 = arith.constant 0 : index
    %c0_33 = arith.constant 0 : index
    %33 = vector.load %arg4[%c1_31, %c0_32, %c0_33] : memref<3x64x64xf32, #tpu.memory_space<vmem>>, vector<1x64x64xf32>
    %34 = vector.shape_cast %33 : vector<1x64x64xf32> to vector<64x64xf32>
    %c2_34 = arith.constant 2 : index
    %c0_35 = arith.constant 0 : index
    %c0_36 = arith.constant 0 : index
    %35 = vector.load %arg4[%c2_34, %c0_35, %c0_36] : memref<3x64x64xf32, #tpu.memory_space<vmem>>, vector<1x64x64xf32>
    %36 = vector.shape_cast %35 : vector<1x64x64xf32> to vector<64x64xf32>
    %c0_37 = arith.constant 0 : index
    %c0_38 = arith.constant 0 : index
    %c0_39 = arith.constant 0 : index
    %37 = vector.load %arg5[%c0_37, %c0_38, %c0_39] : memref<3x1x64xf32, #tpu.memory_space<vmem>>, vector<1x1x64xf32>
    %38 = vector.shape_cast %37 : vector<1x1x64xf32> to vector<1x64xf32>
    %c1_40 = arith.constant 1 : index
    %c0_41 = arith.constant 0 : index
    %c0_42 = arith.constant 0 : index
    %39 = vector.load %arg5[%c1_40, %c0_41, %c0_42] : memref<3x1x64xf32, #tpu.memory_space<vmem>>, vector<1x1x64xf32>
    %40 = vector.shape_cast %39 : vector<1x1x64xf32> to vector<1x64xf32>
    %c2_43 = arith.constant 2 : index
    %c0_44 = arith.constant 0 : index
    %c0_45 = arith.constant 0 : index
    %41 = vector.load %arg5[%c2_43, %c0_44, %c0_45] : memref<3x1x64xf32, #tpu.memory_space<vmem>>, vector<1x1x64xf32>
    %42 = vector.shape_cast %41 : vector<1x1x64xf32> to vector<1x64xf32>
    %cst_46 = arith.constant 0.000000e+00 : f32
    %43 = vector.broadcast %cst_46 : f32 to vector<8x64xf32>
    %c0_47 = arith.constant 0 : index
    %c0_48 = arith.constant 0 : index
    %44 = vector.load %arg1[%c0_47, %c0_48] : memref<64x64xf32, #tpu.memory_space<vmem>>, vector<8x64xf32>
    %cst_49 = arith.constant 5.000000e-01 : f32
    %45 = vector.broadcast %cst_49 : f32 to vector<8x64xf32>
    %46 = arith.cmpf ogt, %44, %45 : vector<8x64xf32>
    %cst_50 = arith.constant dense<0.000000e+00> : vector<8x64xf32>
    %47 = tpu.matmul %43, %32, %cst_50 {dimension_numbers = #tpu.dot_dimension_numbers<[1], [0], [0], [1], [0, 0, 1, 1], [], []>} : vector<8x64xf32>, vector<64x64xf32>, vector<8x64xf32> -> vector<8x64xf32>
    %48 = vector.broadcast %38 : vector<1x64xf32> to vector<8x64xf32>
    %49 = arith.addf %47, %48 : vector<8x64xf32>
    %cst_51 = arith.constant dense<0.000000e+00> : vector<8x64xf32>
    %50 = tpu.matmul %43, %34, %cst_51 {dimension_numbers = #tpu.dot_dimension_numbers<[1], [0], [0], [1], [0, 0, 1, 1], [], []>} : vector<8x64xf32>, vector<64x64xf32>, vector<8x64xf32> -> vector<8x64xf32>
    %51 = vector.broadcast %40 : vector<1x64xf32> to vector<8x64xf32>
    %52 = arith.addf %50, %51 : vector<8x64xf32>
    %cst_52 = arith.constant dense<0.000000e+00> : vector<8x64xf32>
    %53 = tpu.matmul %43, %36, %cst_52 {dimension_numbers = #tpu.dot_dimension_numbers<[1], [0], [0], [1], [0, 0, 1, 1], [], []>} : vector<8x64xf32>, vector<64x64xf32>, vector<8x64xf32> -> vector<8x64xf32>
    %54 = vector.broadcast %42 : vector<1x64xf32> to vector<8x64xf32>
    %55 = arith.addf %53, %54 : vector<8x64xf32>
    %c0_i32 = arith.constant 0 : i32
    %c0_i32_53 = arith.constant 0 : i32
    %c0_i32_54 = arith.constant 0 : i32
    %56 = tpu.memref_slice %arg11[%c0_i32, %c0_i32_53, %c0_i32_54] : memref<3x64x64xf32, #tpu.memory_space<vmem>> -> memref<1x64x64xf32, #tpu.memory_space<vmem>>
    %57 = tpu.memref_squeeze %56 : memref<1x64x64xf32, #tpu.memory_space<vmem>> -> memref<64x64xf32, #tpu.memory_space<vmem>>
    %c0_55 = arith.constant 0 : index
    %c0_56 = arith.constant 0 : index
    %58 = vector.load %57[%c0_55, %c0_56] : memref<64x64xf32, #tpu.memory_space<vmem>>, vector<8x64xf32>
    %59 = arith.addf %58, %49 : vector<8x64xf32>
    %60 = arith.negf %59 : vector<8x64xf32>
    %61 = math.exp %60 : vector<8x64xf32>
    %cst_57 = arith.constant 1.000000e+00 : f32
    %62 = vector.broadcast %cst_57 : f32 to vector<8x64xf32>
    %63 = arith.addf %62, %61 : vector<8x64xf32>
    %64 = arith.divf %62, %63 : vector<8x64xf32>
    %c1_i32 = arith.constant 1 : i32
    %c0_i32_58 = arith.constant 0 : i32
    %c0_i32_59 = arith.constant 0 : i32
    %65 = tpu.memref_slice %arg11[%c1_i32, %c0_i32_58, %c0_i32_59] : memref<3x64x64xf32, #tpu.memory_space<vmem>> -> memref<1x64x64xf32, #tpu.memory_space<vmem>>
    %66 = tpu.memref_squeeze %65 : memref<1x64x64xf32, #tpu.memory_space<vmem>> -> memref<64x64xf32, #tpu.memory_space<vmem>>
    %c0_60 = arith.constant 0 : index
    %c0_61 = arith.constant 0 : index
    %67 = vector.load %66[%c0_60, %c0_61] : memref<64x64xf32, #tpu.memory_space<vmem>>, vector<8x64xf32>
    %68 = arith.addf %67, %52 : vector<8x64xf32>
    %69 = arith.negf %68 : vector<8x64xf32>
    %70 = math.exp %69 : vector<8x64xf32>
    %cst_62 = arith.constant 1.000000e+00 : f32
    %71 = vector.broadcast %cst_62 : f32 to vector<8x64xf32>
    %72 = arith.addf %71, %70 : vector<8x64xf32>
    %73 = arith.divf %71, %72 : vector<8x64xf32>
    %c2_i32 = arith.constant 2 : i32
    %c0_i32_63 = arith.constant 0 : i32
    %c0_i32_64 = arith.constant 0 : i32
    %74 = tpu.memref_slice %arg11[%c2_i32, %c0_i32_63, %c0_i32_64] : memref<3x64x64xf32, #tpu.memory_space<vmem>> -> memref<1x64x64xf32, #tpu.memory_space<vmem>>
    %75 = tpu.memref_squeeze %74 : memref<1x64x64xf32, #tpu.memory_space<vmem>> -> memref<64x64xf32, #tpu.memory_space<vmem>>
    %c0_65 = arith.constant 0 : index
    %c0_66 = arith.constant 0 : index
    %76 = vector.load %75[%c0_65, %c0_66] : memref<64x64xf32, #tpu.memory_space<vmem>>, vector<8x64xf32>
    %77 = arith.mulf %64, %55 : vector<8x64xf32>
    %78 = arith.addf %76, %77 : vector<8x64xf32>
    %79 = math.tanh %78 : vector<8x64xf32>
    %80 = arith.subf %43, %79 : vector<8x64xf32>
    %81 = arith.mulf %73, %80 : vector<8x64xf32>
    %82 = arith.addf %79, %81 : vector<8x64xf32>
    %cst_67 = arith.constant 0.000000e+00 : f32
    %83 = vector.broadcast %cst_67 : f32 to vector<8x64xf32>
    %84 = arith.select %46, %82, %83 : vector<8x64xi1>, vector<8x64xf32>
    %85 = vector.extract_strided_slice %84 {offsets = [0, 0], sizes = [8, 32], strides = [1, 1]} : vector<8x64xf32> to vector<8x32xf32>
    %c0_68 = arith.constant 0 : index
    %c0_69 = arith.constant 0 : index
    %86 = vector.load %arg12[%c0_68, %c0_69] : memref<64x64xf32, #tpu.memory_space<vmem>>, vector<8x32xf32>
    tpu.vector_store %arg12[%c0_68, %c0_69], %85 {strides = array<i32>} : memref<64x64xf32, #tpu.memory_space<vmem>>, vector<8x32xf32>,
    %87 = vector.extract_strided_slice %84 {offsets = [0, 32], sizes = [8, 32], strides = [1, 1]} : vector<8x64xf32> to vector<8x32xf32>
    %c56 = arith.constant 56 : index
    %c32 = arith.constant 32 : index
    %88 = vector.load %arg12[%c56, %c32] : memref<64x64xf32, #tpu.memory_space<vmem>>, vector<8x32xf32>
    tpu.vector_store %arg12[%c56, %c32], %87 {strides = array<i32>} : memref<64x64xf32, #tpu.memory_space<vmem>>, vector<8x32xf32>,
    %89 = arith.select %46, %82, %43 : vector<8x64xi1>, vector<8x64xf32>
    %c8 = arith.constant 8 : index
    %c0_70 = arith.constant 0 : index
    %90 = vector.load %arg1[%c8, %c0_70] : memref<64x64xf32, #tpu.memory_space<vmem>>, vector<8x64xf32>
    %cst_71 = arith.constant 5.000000e-01 : f32
    %91 = vector.broadcast %cst_71 : f32 to vector<8x64xf32>
    %92 = arith.cmpf ogt, %90, %91 : vector<8x64xf32>
    %cst_72 = arith.constant dense<0.000000e+00> : vector<8x64xf32>
    %93 = tpu.matmul %89, %32, %cst_72 {dimension_numbers = #tpu.dot_dimension_numbers<[1], [0], [0], [1], [0, 0, 1, 1], [], []>} : vector<8x64xf32>, vector<64x64xf32>, vector<8x64xf32> -> vector<8x64xf32>
    %94 = vector.broadcast %38 : vector<1x64xf32> to vector<8x64xf32>
    %95 = arith.addf %93, %94 : vector<8x64xf32>
    %cst_73 = arith.constant dense<0.000000e+00> : vector<8x64xf32>
    %96 = tpu.matmul %89, %34, %cst_73 {dimension_numbers = #tpu.dot_dimension_numbers<[1], [0], [0], [1], [0, 0, 1, 1], [], []>} : vector<8x64xf32>, vector<64x64xf32>, vector<8x64xf32> -> vector<8x64xf32>
    %97 = vector.broadcast %40 : vector<1x64xf32> to vector<8x64xf32>
    %98 = arith.addf %96, %97 : vector<8x64xf32>
    %cst_74 = arith.constant dense<0.000000e+00> : vector<8x64xf32>
    %99 = tpu.matmul %89, %36, %cst_74 {dimension_numbers = #tpu.dot_dimension_numbers<[1], [0], [0], [1], [0, 0, 1, 1], [], []>} : vector<8x64xf32>, vector<64x64xf32>, vector<8x64xf32> -> vector<8x64xf32>
    %100 = vector.broadcast %42 : vector<1x64xf32> to vector<8x64xf32>
    %101 = arith.addf %99, %100 : vector<8x64xf32>
    %c0_i32_75 = arith.constant 0 : i32
    %c0_i32_76 = arith.constant 0 : i32
    %c0_i32_77 = arith.constant 0 : i32
    %102 = tpu.memref_slice %arg11[%c0_i32_75, %c0_i32_76, %c0_i32_77] : memref<3x64x64xf32, #tpu.memory_space<vmem>> -> memref<1x64x64xf32, #tpu.memory_space<vmem>>
    %103 = tpu.memref_squeeze %102 : memref<1x64x64xf32, #tpu.memory_space<vmem>> -> memref<64x64xf32, #tpu.memory_space<vmem>>
    %c8_78 = arith.constant 8 : index
    %c0_79 = arith.constant 0 : index
    %104 = vector.load %103[%c8_78, %c0_79] : memref<64x64xf32, #tpu.memory_space<vmem>>, vector<8x64xf32>
    %105 = arith.addf %104, %95 : vector<8x64xf32>
    %106 = arith.negf %105 : vector<8x64xf32>
    %107 = math.exp %106 : vector<8x64xf32>
    %cst_80 = arith.constant 1.000000e+00 : f32
    %108 = vector.broadcast %cst_80 : f32 to vector<8x64xf32>
    %109 = arith.addf %108, %107 : vector<8x64xf32>
    %110 = arith.divf %108, %109 : vector<8x64xf32>
    %c1_i32_81 = arith.constant 1 : i32
    %c0_i32_82 = arith.constant 0 : i32
    %c0_i32_83 = arith.constant 0 : i32
    %111 = tpu.memref_slice %arg11[%c1_i32_81, %c0_i32_82, %c0_i32_83] : memref<3x64x64xf32, #tpu.memory_space<vmem>> -> memref<1x64x64xf32, #tpu.memory_space<vmem>>
    %112 = tpu.memref_squeeze %111 : memref<1x64x64xf32, #tpu.memory_space<vmem>> -> memref<64x64xf32, #tpu.memory_space<vmem>>
    %c8_84 = arith.constant 8 : index
    %c0_85 = arith.constant 0 : index
    %113 = vector.load %112[%c8_84, %c0_85] : memref<64x64xf32, #tpu.memory_space<vmem>>, vector<8x64xf32>
    %114 = arith.addf %113, %98 : vector<8x64xf32>
    %115 = arith.negf %114 : vector<8x64xf32>
    %116 = math.exp %115 : vector<8x64xf32>
    %cst_86 = arith.constant 1.000000e+00 : f32
    %117 = vector.broadcast %cst_86 : f32 to vector<8x64xf32>
    %118 = arith.addf %117, %116 : vector<8x64xf32>
    %119 = arith.divf %117, %118 : vector<8x64xf32>
    %c2_i32_87 = arith.constant 2 : i32
    %c0_i32_88 = arith.constant 0 : i32
    %c0_i32_89 = arith.constant 0 : i32
    %120 = tpu.memref_slice %arg11[%c2_i32_87, %c0_i32_88, %c0_i32_89] : memref<3x64x64xf32, #tpu.memory_space<vmem>> -> memref<1x64x64xf32, #tpu.memory_space<vmem>>
    %121 = tpu.memref_squeeze %120 : memref<1x64x64xf32, #tpu.memory_space<vmem>> -> memref<64x64xf32, #tpu.memory_space<vmem>>
    %c8_90 = arith.constant 8 : index
    %c0_91 = arith.constant 0 : index
    %122 = vector.load %121[%c8_90, %c0_91] : memref<64x64xf32, #tpu.memory_space<vmem>>, vector<8x64xf32>
    %123 = arith.mulf %110, %101 : vector<8x64xf32>
    %124 = arith.addf %122, %123 : vector<8x64xf32>
    %125 = math.tanh %124 : vector<8x64xf32>
    %126 = arith.subf %89, %125 : vector<8x64xf32>
    %127 = arith.mulf %119, %126 : vector<8x64xf32>
    %128 = arith.addf %125, %127 : vector<8x64xf32>
    %cst_92 = arith.constant 0.000000e+00 : f32
    %129 = vector.broadcast %cst_92 : f32 to vector<8x64xf32>
    %130 = arith.select %92, %128, %129 : vector<8x64xi1>, vector<8x64xf32>
    %131 = vector.extract_strided_slice %130 {offsets = [0, 0], sizes = [8, 32], strides = [1, 1]} : vector<8x64xf32> to vector<8x32xf32>
    %c8_93 = arith.constant 8 : index
    %c0_94 = arith.constant 0 : index
    %132 = vector.load %arg12[%c8_93, %c0_94] : memref<64x64xf32, #tpu.memory_space<vmem>>, vector<8x32xf32>
    tpu.vector_store %arg12[%c8_93, %c0_94], %131 {strides = array<i32>} : memref<64x64xf32, #tpu.memory_space<vmem>>, vector<8x32xf32>,
    %133 = vector.extract_strided_slice %130 {offsets = [0, 32], sizes = [8, 32], strides = [1, 1]} : vector<8x64xf32> to vector<8x32xf32>
    %c48 = arith.constant 48 : index
    %c32_95 = arith.constant 32 : index
    %134 = vector.load %arg12[%c48, %c32_95] : memref<64x64xf32, #tpu.memory_space<vmem>>, vector<8x32xf32>
    tpu.vector_store %arg12[%c48, %c32_95], %133 {strides = array<i32>} : memref<64x64xf32, #tpu.memory_space<vmem>>, vector<8x32xf32>,
    %135 = arith.select %92, %128, %89 : vector<8x64xi1>, vector<8x64xf32>
    %c16 = arith.constant 16 : index
    %c0_96 = arith.constant 0 : index
    %136 = vector.load %arg1[%c16, %c0_96] : memref<64x64xf32, #tpu.memory_space<vmem>>, vector<8x64xf32>
    %cst_97 = arith.constant 5.000000e-01 : f32
    %137 = vector.broadcast %cst_97 : f32 to vector<8x64xf32>
    %138 = arith.cmpf ogt, %136, %137 : vector<8x64xf32>
    %cst_98 = arith.constant dense<0.000000e+00> : vector<8x64xf32>
    %139 = tpu.matmul %135, %32, %cst_98 {dimension_numbers = #tpu.dot_dimension_numbers<[1], [0], [0], [1], [0, 0, 1, 1], [], []>} : vector<8x64xf32>, vector<64x64xf32>, vector<8x64xf32> -> vector<8x64xf32>
    %140 = vector.broadcast %38 : vector<1x64xf32> to vector<8x64xf32>
    %141 = arith.addf %139, %140 : vector<8x64xf32>
    %cst_99 = arith.constant dense<0.000000e+00> : vector<8x64xf32>
    %142 = tpu.matmul %135, %34, %cst_99 {dimension_numbers = #tpu.dot_dimension_numbers<[1], [0], [0], [1], [0, 0, 1, 1], [], []>} : vector<8x64xf32>, vector<64x64xf32>, vector<8x64xf32> -> vector<8x64xf32>
    %143 = vector.broadcast %40 : vector<1x64xf32> to vector<8x64xf32>
    %144 = arith.addf %142, %143 : vector<8x64xf32>
    %cst_100 = arith.constant dense<0.000000e+00> : vector<8x64xf32>
    %145 = tpu.matmul %135, %36, %cst_100 {dimension_numbers = #tpu.dot_dimension_numbers<[1], [0], [0], [1], [0, 0, 1, 1], [], []>} : vector<8x64xf32>, vector<64x64xf32>, vector<8x64xf32> -> vector<8x64xf32>
    %146 = vector.broadcast %42 : vector<1x64xf32> to vector<8x64xf32>
    %147 = arith.addf %145, %146 : vector<8x64xf32>
    %c0_i32_101 = arith.constant 0 : i32
    %c0_i32_102 = arith.constant 0 : i32
    %c0_i32_103 = arith.constant 0 : i32
    %148 = tpu.memref_slice %arg11[%c0_i32_101, %c0_i32_102, %c0_i32_103] : memref<3x64x64xf32, #tpu.memory_space<vmem>> -> memref<1x64x64xf32, #tpu.memory_space<vmem>>
    %149 = tpu.memref_squeeze %148 : memref<1x64x64xf32, #tpu.memory_space<vmem>> -> memref<64x64xf32, #tpu.memory_space<vmem>>
    %c16_104 = arith.constant 16 : index
    %c0_105 = arith.constant 0 : index
    %150 = vector.load %149[%c16_104, %c0_105] : memref<64x64xf32, #tpu.memory_space<vmem>>, vector<8x64xf32>
    %151 = arith.addf %150, %141 : vector<8x64xf32>
    %152 = arith.negf %151 : vector<8x64xf32>
    %153 = math.exp %152 : vector<8x64xf32>
    %cst_106 = arith.constant 1.000000e+00 : f32
    %154 = vector.broadcast %cst_106 : f32 to vector<8x64xf32>
    %155 = arith.addf %154, %153 : vector<8x64xf32>
    %156 = arith.divf %154, %155 : vector<8x64xf32>
    %c1_i32_107 = arith.constant 1 : i32
    %c0_i32_108 = arith.constant 0 : i32
    %c0_i32_109 = arith.constant 0 : i32
    %157 = tpu.memref_slice %arg11[%c1_i32_107, %c0_i32_108, %c0_i32_109] : memref<3x64x64xf32, #tpu.memory_space<vmem>> -> memref<1x64x64xf32, #tpu.memory_space<vmem>>
    %158 = tpu.memref_squeeze %157 : memref<1x64x64xf32, #tpu.memory_space<vmem>> -> memref<64x64xf32, #tpu.memory_space<vmem>>
    %c16_110 = arith.constant 16 : index
    %c0_111 = arith.constant 0 : index
    %159 = vector.load %158[%c16_110, %c0_111] : memref<64x64xf32, #tpu.memory_space<vmem>>, vector<8x64xf32>
    %160 = arith.addf %159, %144 : vector<8x64xf32>
    %161 = arith.negf %160 : vector<8x64xf32>
    %162 = math.exp %161 : vector<8x64xf32>
    %cst_112 = arith.constant 1.000000e+00 : f32
    %163 = vector.broadcast %cst_112 : f32 to vector<8x64xf32>
    %164 = arith.addf %163, %162 : vector<8x64xf32>
    %165 = arith.divf %163, %164 : vector<8x64xf32>
    %c2_i32_113 = arith.constant 2 : i32
    %c0_i32_114 = arith.constant 0 : i32
    %c0_i32_115 = arith.constant 0 : i32
    %166 = tpu.memref_slice %arg11[%c2_i32_113, %c0_i32_114, %c0_i32_115] : memref<3x64x64xf32, #tpu.memory_space<vmem>> -> memref<1x64x64xf32, #tpu.memory_space<vmem>>
    %167 = tpu.memref_squeeze %166 : memref<1x64x64xf32, #tpu.memory_space<vmem>> -> memref<64x64xf32, #tpu.memory_space<vmem>>
    %c16_116 = arith.constant 16 : index
    %c0_117 = arith.constant 0 : index
    %168 = vector.load %167[%c16_116, %c0_117] : memref<64x64xf32, #tpu.memory_space<vmem>>, vector<8x64xf32>
    %169 = arith.mulf %156, %147 : vector<8x64xf32>
    %170 = arith.addf %168, %169 : vector<8x64xf32>
    %171 = math.tanh %170 : vector<8x64xf32>
    %172 = arith.subf %135, %171 : vector<8x64xf32>
    %173 = arith.mulf %165, %172 : vector<8x64xf32>
    %174 = arith.addf %171, %173 : vector<8x64xf32>
    %cst_118 = arith.constant 0.000000e+00 : f32
    %175 = vector.broadcast %cst_118 : f32 to vector<8x64xf32>
    %176 = arith.select %138, %174, %175 : vector<8x64xi1>, vector<8x64xf32>
    %177 = vector.extract_strided_slice %176 {offsets = [0, 0], sizes = [8, 32], strides = [1, 1]} : vector<8x64xf32> to vector<8x32xf32>
    %c16_119 = arith.constant 16 : index
    %c0_120 = arith.constant 0 : index
    %178 = vector.load %arg12[%c16_119, %c0_120] : memref<64x64xf32, #tpu.memory_space<vmem>>, vector<8x32xf32>
    tpu.vector_store %arg12[%c16_119, %c0_120], %177 {strides = array<i32>} : memref<64x64xf32, #tpu.memory_space<vmem>>, vector<8x32xf32>,
    %179 = vector.extract_strided_slice %176 {offsets = [0, 32], sizes = [8, 32], strides = [1, 1]} : vector<8x64xf32> to vector<8x32xf32>
    %c40 = arith.constant 40 : index
    %c32_121 = arith.constant 32 : index
    %180 = vector.load %arg12[%c40, %c32_121] : memref<64x64xf32, #tpu.memory_space<vmem>>, vector<8x32xf32>
    tpu.vector_store %arg12[%c40, %c32_121], %179 {strides = array<i32>} : memref<64x64xf32, #tpu.memory_space<vmem>>, vector<8x32xf32>,
    %181 = arith.select %138, %174, %135 : vector<8x64xi1>, vector<8x64xf32>
    %c24 = arith.constant 24 : index
    %c0_122 = arith.constant 0 : index
    %182 = vector.load %arg1[%c24, %c0_122] : memref<64x64xf32, #tpu.memory_space<vmem>>, vector<8x64xf32>
    %cst_123 = arith.constant 5.000000e-01 : f32
    %183 = vector.broadcast %cst_123 : f32 to vector<8x64xf32>
    %184 = arith.cmpf ogt, %182, %183 : vector<8x64xf32>
    %cst_124 = arith.constant dense<0.000000e+00> : vector<8x64xf32>
    %185 = tpu.matmul %181, %32, %cst_124 {dimension_numbers = #tpu.dot_dimension_numbers<[1], [0], [0], [1], [0, 0, 1, 1], [], []>} : vector<8x64xf32>, vector<64x64xf32>, vector<8x64xf32> -> vector<8x64xf32>
    %186 = vector.broadcast %38 : vector<1x64xf32> to vector<8x64xf32>
    %187 = arith.addf %185, %186 : vector<8x64xf32>
    %cst_125 = arith.constant dense<0.000000e+00> : vector<8x64xf32>
    %188 = tpu.matmul %181, %34, %cst_125 {dimension_numbers = #tpu.dot_dimension_numbers<[1], [0], [0], [1], [0, 0, 1, 1], [], []>} : vector<8x64xf32>, vector<64x64xf32>, vector<8x64xf32> -> vector<8x64xf32>
    %189 = vector.broadcast %40 : vector<1x64xf32> to vector<8x64xf32>
    %190 = arith.addf %188, %189 : vector<8x64xf32>
    %cst_126 = arith.constant dense<0.000000e+00> : vector<8x64xf32>
    %191 = tpu.matmul %181, %36, %cst_126 {dimension_numbers = #tpu.dot_dimension_numbers<[1], [0], [0], [1], [0, 0, 1, 1], [], []>} : vector<8x64xf32>, vector<64x64xf32>, vector<8x64xf32> -> vector<8x64xf32>
    %192 = vector.broadcast %42 : vector<1x64xf32> to vector<8x64xf32>
    %193 = arith.addf %191, %192 : vector<8x64xf32>
    %c0_i32_127 = arith.constant 0 : i32
    %c0_i32_128 = arith.constant 0 : i32
    %c0_i32_129 = arith.constant 0 : i32
    %194 = tpu.memref_slice %arg11[%c0_i32_127, %c0_i32_128, %c0_i32_129] : memref<3x64x64xf32, #tpu.memory_space<vmem>> -> memref<1x64x64xf32, #tpu.memory_space<vmem>>
    %195 = tpu.memref_squeeze %194 : memref<1x64x64xf32, #tpu.memory_space<vmem>> -> memref<64x64xf32, #tpu.memory_space<vmem>>
    %c24_130 = arith.constant 24 : index
    %c0_131 = arith.constant 0 : index
    %196 = vector.load %195[%c24_130, %c0_131] : memref<64x64xf32, #tpu.memory_space<vmem>>, vector<8x64xf32>
    %197 = arith.addf %196, %187 : vector<8x64xf32>
    %198 = arith.negf %197 : vector<8x64xf32>
    %199 = math.exp %198 : vector<8x64xf32>
    %cst_132 = arith.constant 1.000000e+00 : f32
    %200 = vector.broadcast %cst_132 : f32 to vector<8x64xf32>
    %201 = arith.addf %200, %199 : vector<8x64xf32>
    %202 = arith.divf %200, %201 : vector<8x64xf32>
    %c1_i32_133 = arith.constant 1 : i32
    %c0_i32_134 = arith.constant 0 : i32
    %c0_i32_135 = arith.constant 0 : i32
    %203 = tpu.memref_slice %arg11[%c1_i32_133, %c0_i32_134, %c0_i32_135] : memref<3x64x64xf32, #tpu.memory_space<vmem>> -> memref<1x64x64xf32, #tpu.memory_space<vmem>>
    %204 = tpu.memref_squeeze %203 : memref<1x64x64xf32, #tpu.memory_space<vmem>> -> memref<64x64xf32, #tpu.memory_space<vmem>>
    %c24_136 = arith.constant 24 : index
    %c0_137 = arith.constant 0 : index
    %205 = vector.load %204[%c24_136, %c0_137] : memref<64x64xf32, #tpu.memory_space<vmem>>, vector<8x64xf32>
    %206 = arith.addf %205, %190 : vector<8x64xf32>
    %207 = arith.negf %206 : vector<8x64xf32>
    %208 = math.exp %207 : vector<8x64xf32>
    %cst_138 = arith.constant 1.000000e+00 : f32
    %209 = vector.broadcast %cst_138 : f32 to vector<8x64xf32>
    %210 = arith.addf %209, %208 : vector<8x64xf32>
    %211 = arith.divf %209, %210 : vector<8x64xf32>
    %c2_i32_139 = arith.constant 2 : i32
    %c0_i32_140 = arith.constant 0 : i32
    %c0_i32_141 = arith.constant 0 : i32
    %212 = tpu.memref_slice %arg11[%c2_i32_139, %c0_i32_140, %c0_i32_141] : memref<3x64x64xf32, #tpu.memory_space<vmem>> -> memref<1x64x64xf32, #tpu.memory_space<vmem>>
    %213 = tpu.memref_squeeze %212 : memref<1x64x64xf32, #tpu.memory_space<vmem>> -> memref<64x64xf32, #tpu.memory_space<vmem>>
    %c24_142 = arith.constant 24 : index
    %c0_143 = arith.constant 0 : index
    %214 = vector.load %213[%c24_142, %c0_143] : memref<64x64xf32, #tpu.memory_space<vmem>>, vector<8x64xf32>
    %215 = arith.mulf %202, %193 : vector<8x64xf32>
    %216 = arith.addf %214, %215 : vector<8x64xf32>
    %217 = math.tanh %216 : vector<8x64xf32>
    %218 = arith.subf %181, %217 : vector<8x64xf32>
    %219 = arith.mulf %211, %218 : vector<8x64xf32>
    %220 = arith.addf %217, %219 : vector<8x64xf32>
    %cst_144 = arith.constant 0.000000e+00 : f32
    %221 = vector.broadcast %cst_144 : f32 to vector<8x64xf32>
    %222 = arith.select %184, %220, %221 : vector<8x64xi1>, vector<8x64xf32>
    %223 = vector.extract_strided_slice %222 {offsets = [0, 0], sizes = [8, 32], strides = [1, 1]} : vector<8x64xf32> to vector<8x32xf32>
    %c24_145 = arith.constant 24 : index
    %c0_146 = arith.constant 0 : index
    %224 = vector.load %arg12[%c24_145, %c0_146] : memref<64x64xf32, #tpu.memory_space<vmem>>, vector<8x32xf32>
    tpu.vector_store %arg12[%c24_145, %c0_146], %223 {strides = array<i32>} : memref<64x64xf32, #tpu.memory_space<vmem>>, vector<8x32xf32>,
    %225 = vector.extract_strided_slice %222 {offsets = [0, 32], sizes = [8, 32], strides = [1, 1]} : vector<8x64xf32> to vector<8x32xf32>
    %c32_147 = arith.constant 32 : index
    %c32_148 = arith.constant 32 : index
    %226 = vector.load %arg12[%c32_147, %c32_148] : memref<64x64xf32, #tpu.memory_space<vmem>>, vector<8x32xf32>
    tpu.vector_store %arg12[%c32_147, %c32_148], %225 {strides = array<i32>} : memref<64x64xf32, #tpu.memory_space<vmem>>, vector<8x32xf32>,
    %227 = arith.select %184, %220, %181 : vector<8x64xi1>, vector<8x64xf32>
    %c32_149 = arith.constant 32 : index
    %c0_150 = arith.constant 0 : index
    %228 = vector.load %arg1[%c32_149, %c0_150] : memref<64x64xf32, #tpu.memory_space<vmem>>, vector<8x64xf32>
    %cst_151 = arith.constant 5.000000e-01 : f32
    %229 = vector.broadcast %cst_151 : f32 to vector<8x64xf32>
    %230 = arith.cmpf ogt, %228, %229 : vector<8x64xf32>
    %cst_152 = arith.constant dense<0.000000e+00> : vector<8x64xf32>
    %231 = tpu.matmul %227, %32, %cst_152 {dimension_numbers = #tpu.dot_dimension_numbers<[1], [0], [0], [1], [0, 0, 1, 1], [], []>} : vector<8x64xf32>, vector<64x64xf32>, vector<8x64xf32> -> vector<8x64xf32>
    %232 = vector.broadcast %38 : vector<1x64xf32> to vector<8x64xf32>
    %233 = arith.addf %231, %232 : vector<8x64xf32>
    %cst_153 = arith.constant dense<0.000000e+00> : vector<8x64xf32>
    %234 = tpu.matmul %227, %34, %cst_153 {dimension_numbers = #tpu.dot_dimension_numbers<[1], [0], [0], [1], [0, 0, 1, 1], [], []>} : vector<8x64xf32>, vector<64x64xf32>, vector<8x64xf32> -> vector<8x64xf32>
    %235 = vector.broadcast %40 : vector<1x64xf32> to vector<8x64xf32>
    %236 = arith.addf %234, %235 : vector<8x64xf32>
    %cst_154 = arith.constant dense<0.000000e+00> : vector<8x64xf32>
    %237 = tpu.matmul %227, %36, %cst_154 {dimension_numbers = #tpu.dot_dimension_numbers<[1], [0], [0], [1], [0, 0, 1, 1], [], []>} : vector<8x64xf32>, vector<64x64xf32>, vector<8x64xf32> -> vector<8x64xf32>
    %238 = vector.broadcast %42 : vector<1x64xf32> to vector<8x64xf32>
    %239 = arith.addf %237, %238 : vector<8x64xf32>
    %c0_i32_155 = arith.constant 0 : i32
    %c0_i32_156 = arith.constant 0 : i32
    %c0_i32_157 = arith.constant 0 : i32
    %240 = tpu.memref_slice %arg11[%c0_i32_155, %c0_i32_156, %c0_i32_157] : memref<3x64x64xf32, #tpu.memory_space<vmem>> -> memref<1x64x64xf32, #tpu.memory_space<vmem>>
    %241 = tpu.memref_squeeze %240 : memref<1x64x64xf32, #tpu.memory_space<vmem>> -> memref<64x64xf32, #tpu.memory_space<vmem>>
    %c32_158 = arith.constant 32 : index
    %c0_159 = arith.constant 0 : index
    %242 = vector.load %241[%c32_158, %c0_159] : memref<64x64xf32, #tpu.memory_space<vmem>>, vector<8x64xf32>
    %243 = arith.addf %242, %233 : vector<8x64xf32>
    %244 = arith.negf %243 : vector<8x64xf32>
    %245 = math.exp %244 : vector<8x64xf32>
    %cst_160 = arith.constant 1.000000e+00 : f32
    %246 = vector.broadcast %cst_160 : f32 to vector<8x64xf32>
    %247 = arith.addf %246, %245 : vector<8x64xf32>
    %248 = arith.divf %246, %247 : vector<8x64xf32>
    %c1_i32_161 = arith.constant 1 : i32
    %c0_i32_162 = arith.constant 0 : i32
    %c0_i32_163 = arith.constant 0 : i32
    %249 = tpu.memref_slice %arg11[%c1_i32_161, %c0_i32_162, %c0_i32_163] : memref<3x64x64xf32, #tpu.memory_space<vmem>> -> memref<1x64x64xf32, #tpu.memory_space<vmem>>
    %250 = tpu.memref_squeeze %249 : memref<1x64x64xf32, #tpu.memory_space<vmem>> -> memref<64x64xf32, #tpu.memory_space<vmem>>
    %c32_164 = arith.constant 32 : index
    %c0_165 = arith.constant 0 : index
    %251 = vector.load %250[%c32_164, %c0_165] : memref<64x64xf32, #tpu.memory_space<vmem>>, vector<8x64xf32>
    %252 = arith.addf %251, %236 : vector<8x64xf32>
    %253 = arith.negf %252 : vector<8x64xf32>
    %254 = math.exp %253 : vector<8x64xf32>
    %cst_166 = arith.constant 1.000000e+00 : f32
    %255 = vector.broadcast %cst_166 : f32 to vector<8x64xf32>
    %256 = arith.addf %255, %254 : vector<8x64xf32>
    %257 = arith.divf %255, %256 : vector<8x64xf32>
    %c2_i32_167 = arith.constant 2 : i32
    %c0_i32_168 = arith.constant 0 : i32
    %c0_i32_169 = arith.constant 0 : i32
    %258 = tpu.memref_slice %arg11[%c2_i32_167, %c0_i32_168, %c0_i32_169] : memref<3x64x64xf32, #tpu.memory_space<vmem>> -> memref<1x64x64xf32, #tpu.memory_space<vmem>>
    %259 = tpu.memref_squeeze %258 : memref<1x64x64xf32, #tpu.memory_space<vmem>> -> memref<64x64xf32, #tpu.memory_space<vmem>>
    %c32_170 = arith.constant 32 : index
    %c0_171 = arith.constant 0 : index
    %260 = vector.load %259[%c32_170, %c0_171] : memref<64x64xf32, #tpu.memory_space<vmem>>, vector<8x64xf32>
    %261 = arith.mulf %248, %239 : vector<8x64xf32>
    %262 = arith.addf %260, %261 : vector<8x64xf32>
    %263 = math.tanh %262 : vector<8x64xf32>
    %264 = arith.subf %227, %263 : vector<8x64xf32>
    %265 = arith.mulf %257, %264 : vector<8x64xf32>
    %266 = arith.addf %263, %265 : vector<8x64xf32>
    %cst_172 = arith.constant 0.000000e+00 : f32
    %267 = vector.broadcast %cst_172 : f32 to vector<8x64xf32>
    %268 = arith.select %230, %266, %267 : vector<8x64xi1>, vector<8x64xf32>
    %269 = vector.extract_strided_slice %268 {offsets = [0, 0], sizes = [8, 32], strides = [1, 1]} : vector<8x64xf32> to vector<8x32xf32>
    %c32_173 = arith.constant 32 : index
    %c0_174 = arith.constant 0 : index
    %270 = vector.load %arg12[%c32_173, %c0_174] : memref<64x64xf32, #tpu.memory_space<vmem>>, vector<8x32xf32>
    tpu.vector_store %arg12[%c32_173, %c0_174], %269 {strides = array<i32>} : memref<64x64xf32, #tpu.memory_space<vmem>>, vector<8x32xf32>,
    %271 = vector.extract_strided_slice %268 {offsets = [0, 32], sizes = [8, 32], strides = [1, 1]} : vector<8x64xf32> to vector<8x32xf32>
    %c24_175 = arith.constant 24 : index
    %c32_176 = arith.constant 32 : index
    %272 = vector.load %arg12[%c24_175, %c32_176] : memref<64x64xf32, #tpu.memory_space<vmem>>, vector<8x32xf32>
    tpu.vector_store %arg12[%c24_175, %c32_176], %271 {strides = array<i32>} : memref<64x64xf32, #tpu.memory_space<vmem>>, vector<8x32xf32>,
    %273 = arith.select %230, %266, %227 : vector<8x64xi1>, vector<8x64xf32>
    %c40_177 = arith.constant 40 : index
    %c0_178 = arith.constant 0 : index
    %274 = vector.load %arg1[%c40_177, %c0_178] : memref<64x64xf32, #tpu.memory_space<vmem>>, vector<8x64xf32>
    %cst_179 = arith.constant 5.000000e-01 : f32
    %275 = vector.broadcast %cst_179 : f32 to vector<8x64xf32>
    %276 = arith.cmpf ogt, %274, %275 : vector<8x64xf32>
    %cst_180 = arith.constant dense<0.000000e+00> : vector<8x64xf32>
    %277 = tpu.matmul %273, %32, %cst_180 {dimension_numbers = #tpu.dot_dimension_numbers<[1], [0], [0], [1], [0, 0, 1, 1], [], []>} : vector<8x64xf32>, vector<64x64xf32>, vector<8x64xf32> -> vector<8x64xf32>
    %278 = vector.broadcast %38 : vector<1x64xf32> to vector<8x64xf32>
    %279 = arith.addf %277, %278 : vector<8x64xf32>
    %cst_181 = arith.constant dense<0.000000e+00> : vector<8x64xf32>
    %280 = tpu.matmul %273, %34, %cst_181 {dimension_numbers = #tpu.dot_dimension_numbers<[1], [0], [0], [1], [0, 0, 1, 1], [], []>} : vector<8x64xf32>, vector<64x64xf32>, vector<8x64xf32> -> vector<8x64xf32>
    %281 = vector.broadcast %40 : vector<1x64xf32> to vector<8x64xf32>
    %282 = arith.addf %280, %281 : vector<8x64xf32>
    %cst_182 = arith.constant dense<0.000000e+00> : vector<8x64xf32>
    %283 = tpu.matmul %273, %36, %cst_182 {dimension_numbers = #tpu.dot_dimension_numbers<[1], [0], [0], [1], [0, 0, 1, 1], [], []>} : vector<8x64xf32>, vector<64x64xf32>, vector<8x64xf32> -> vector<8x64xf32>
    %284 = vector.broadcast %42 : vector<1x64xf32> to vector<8x64xf32>
    %285 = arith.addf %283, %284 : vector<8x64xf32>
    %c0_i32_183 = arith.constant 0 : i32
    %c0_i32_184 = arith.constant 0 : i32
    %c0_i32_185 = arith.constant 0 : i32
    %286 = tpu.memref_slice %arg11[%c0_i32_183, %c0_i32_184, %c0_i32_185] : memref<3x64x64xf32, #tpu.memory_space<vmem>> -> memref<1x64x64xf32, #tpu.memory_space<vmem>>
    %287 = tpu.memref_squeeze %286 : memref<1x64x64xf32, #tpu.memory_space<vmem>> -> memref<64x64xf32, #tpu.memory_space<vmem>>
    %c40_186 = arith.constant 40 : index
    %c0_187 = arith.constant 0 : index
    %288 = vector.load %287[%c40_186, %c0_187] : memref<64x64xf32, #tpu.memory_space<vmem>>, vector<8x64xf32>
    %289 = arith.addf %288, %279 : vector<8x64xf32>
    %290 = arith.negf %289 : vector<8x64xf32>
    %291 = math.exp %290 : vector<8x64xf32>
    %cst_188 = arith.constant 1.000000e+00 : f32
    %292 = vector.broadcast %cst_188 : f32 to vector<8x64xf32>
    %293 = arith.addf %292, %291 : vector<8x64xf32>
    %294 = arith.divf %292, %293 : vector<8x64xf32>
    %c1_i32_189 = arith.constant 1 : i32
    %c0_i32_190 = arith.constant 0 : i32
    %c0_i32_191 = arith.constant 0 : i32
    %295 = tpu.memref_slice %arg11[%c1_i32_189, %c0_i32_190, %c0_i32_191] : memref<3x64x64xf32, #tpu.memory_space<vmem>> -> memref<1x64x64xf32, #tpu.memory_space<vmem>>
    %296 = tpu.memref_squeeze %295 : memref<1x64x64xf32, #tpu.memory_space<vmem>> -> memref<64x64xf32, #tpu.memory_space<vmem>>
    %c40_192 = arith.constant 40 : index
    %c0_193 = arith.constant 0 : index
    %297 = vector.load %296[%c40_192, %c0_193] : memref<64x64xf32, #tpu.memory_space<vmem>>, vector<8x64xf32>
    %298 = arith.addf %297, %282 : vector<8x64xf32>
    %299 = arith.negf %298 : vector<8x64xf32>
    %300 = math.exp %299 : vector<8x64xf32>
    %cst_194 = arith.constant 1.000000e+00 : f32
    %301 = vector.broadcast %cst_194 : f32 to vector<8x64xf32>
    %302 = arith.addf %301, %300 : vector<8x64xf32>
    %303 = arith.divf %301, %302 : vector<8x64xf32>
    %c2_i32_195 = arith.constant 2 : i32
    %c0_i32_196 = arith.constant 0 : i32
    %c0_i32_197 = arith.constant 0 : i32
    %304 = tpu.memref_slice %arg11[%c2_i32_195, %c0_i32_196, %c0_i32_197] : memref<3x64x64xf32, #tpu.memory_space<vmem>> -> memref<1x64x64xf32, #tpu.memory_space<vmem>>
    %305 = tpu.memref_squeeze %304 : memref<1x64x64xf32, #tpu.memory_space<vmem>> -> memref<64x64xf32, #tpu.memory_space<vmem>>
    %c40_198 = arith.constant 40 : index
    %c0_199 = arith.constant 0 : index
    %306 = vector.load %305[%c40_198, %c0_199] : memref<64x64xf32, #tpu.memory_space<vmem>>, vector<8x64xf32>
    %307 = arith.mulf %294, %285 : vector<8x64xf32>
    %308 = arith.addf %306, %307 : vector<8x64xf32>
    %309 = math.tanh %308 : vector<8x64xf32>
    %310 = arith.subf %273, %309 : vector<8x64xf32>
    %311 = arith.mulf %303, %310 : vector<8x64xf32>
    %312 = arith.addf %309, %311 : vector<8x64xf32>
    %cst_200 = arith.constant 0.000000e+00 : f32
    %313 = vector.broadcast %cst_200 : f32 to vector<8x64xf32>
    %314 = arith.select %276, %312, %313 : vector<8x64xi1>, vector<8x64xf32>
    %315 = vector.extract_strided_slice %314 {offsets = [0, 0], sizes = [8, 32], strides = [1, 1]} : vector<8x64xf32> to vector<8x32xf32>
    %c40_201 = arith.constant 40 : index
    %c0_202 = arith.constant 0 : index
    %316 = vector.load %arg12[%c40_201, %c0_202] : memref<64x64xf32, #tpu.memory_space<vmem>>, vector<8x32xf32>
    tpu.vector_store %arg12[%c40_201, %c0_202], %315 {strides = array<i32>} : memref<64x64xf32, #tpu.memory_space<vmem>>, vector<8x32xf32>,
    %317 = vector.extract_strided_slice %314 {offsets = [0, 32], sizes = [8, 32], strides = [1, 1]} : vector<8x64xf32> to vector<8x32xf32>
    %c16_203 = arith.constant 16 : index
    %c32_204 = arith.constant 32 : index
    %318 = vector.load %arg12[%c16_203, %c32_204] : memref<64x64xf32, #tpu.memory_space<vmem>>, vector<8x32xf32>
    tpu.vector_store %arg12[%c16_203, %c32_204], %317 {strides = array<i32>} : memref<64x64xf32, #tpu.memory_space<vmem>>, vector<8x32xf32>,
    %319 = arith.select %276, %312, %273 : vector<8x64xi1>, vector<8x64xf32>
    %c48_205 = arith.constant 48 : index
    %c0_206 = arith.constant 0 : index
    %320 = vector.load %arg1[%c48_205, %c0_206] : memref<64x64xf32, #tpu.memory_space<vmem>>, vector<8x64xf32>
    %cst_207 = arith.constant 5.000000e-01 : f32
    %321 = vector.broadcast %cst_207 : f32 to vector<8x64xf32>
    %322 = arith.cmpf ogt, %320, %321 : vector<8x64xf32>
    %cst_208 = arith.constant dense<0.000000e+00> : vector<8x64xf32>
    %323 = tpu.matmul %319, %32, %cst_208 {dimension_numbers = #tpu.dot_dimension_numbers<[1], [0], [0], [1], [0, 0, 1, 1], [], []>} : vector<8x64xf32>, vector<64x64xf32>, vector<8x64xf32> -> vector<8x64xf32>
    %324 = vector.broadcast %38 : vector<1x64xf32> to vector<8x64xf32>
    %325 = arith.addf %323, %324 : vector<8x64xf32>
    %cst_209 = arith.constant dense<0.000000e+00> : vector<8x64xf32>
    %326 = tpu.matmul %319, %34, %cst_209 {dimension_numbers = #tpu.dot_dimension_numbers<[1], [0], [0], [1], [0, 0, 1, 1], [], []>} : vector<8x64xf32>, vector<64x64xf32>, vector<8x64xf32> -> vector<8x64xf32>
    %327 = vector.broadcast %40 : vector<1x64xf32> to vector<8x64xf32>
    %328 = arith.addf %326, %327 : vector<8x64xf32>
    %cst_210 = arith.constant dense<0.000000e+00> : vector<8x64xf32>
    %329 = tpu.matmul %319, %36, %cst_210 {dimension_numbers = #tpu.dot_dimension_numbers<[1], [0], [0], [1], [0, 0, 1, 1], [], []>} : vector<8x64xf32>, vector<64x64xf32>, vector<8x64xf32> -> vector<8x64xf32>
    %330 = vector.broadcast %42 : vector<1x64xf32> to vector<8x64xf32>
    %331 = arith.addf %329, %330 : vector<8x64xf32>
    %c0_i32_211 = arith.constant 0 : i32
    %c0_i32_212 = arith.constant 0 : i32
    %c0_i32_213 = arith.constant 0 : i32
    %332 = tpu.memref_slice %arg11[%c0_i32_211, %c0_i32_212, %c0_i32_213] : memref<3x64x64xf32, #tpu.memory_space<vmem>> -> memref<1x64x64xf32, #tpu.memory_space<vmem>>
    %333 = tpu.memref_squeeze %332 : memref<1x64x64xf32, #tpu.memory_space<vmem>> -> memref<64x64xf32, #tpu.memory_space<vmem>>
    %c48_214 = arith.constant 48 : index
    %c0_215 = arith.constant 0 : index
    %334 = vector.load %333[%c48_214, %c0_215] : memref<64x64xf32, #tpu.memory_space<vmem>>, vector<8x64xf32>
    %335 = arith.addf %334, %325 : vector<8x64xf32>
    %336 = arith.negf %335 : vector<8x64xf32>
    %337 = math.exp %336 : vector<8x64xf32>
    %cst_216 = arith.constant 1.000000e+00 : f32
    %338 = vector.broadcast %cst_216 : f32 to vector<8x64xf32>
    %339 = arith.addf %338, %337 : vector<8x64xf32>
    %340 = arith.divf %338, %339 : vector<8x64xf32>
    %c1_i32_217 = arith.constant 1 : i32
    %c0_i32_218 = arith.constant 0 : i32
    %c0_i32_219 = arith.constant 0 : i32
    %341 = tpu.memref_slice %arg11[%c1_i32_217, %c0_i32_218, %c0_i32_219] : memref<3x64x64xf32, #tpu.memory_space<vmem>> -> memref<1x64x64xf32, #tpu.memory_space<vmem>>
    %342 = tpu.memref_squeeze %341 : memref<1x64x64xf32, #tpu.memory_space<vmem>> -> memref<64x64xf32, #tpu.memory_space<vmem>>
    %c48_220 = arith.constant 48 : index
    %c0_221 = arith.constant 0 : index
    %343 = vector.load %342[%c48_220, %c0_221] : memref<64x64xf32, #tpu.memory_space<vmem>>, vector<8x64xf32>
    %344 = arith.addf %343, %328 : vector<8x64xf32>
    %345 = arith.negf %344 : vector<8x64xf32>
    %346 = math.exp %345 : vector<8x64xf32>
    %cst_222 = arith.constant 1.000000e+00 : f32
    %347 = vector.broadcast %cst_222 : f32 to vector<8x64xf32>
    %348 = arith.addf %347, %346 : vector<8x64xf32>
    %349 = arith.divf %347, %348 : vector<8x64xf32>
    %c2_i32_223 = arith.constant 2 : i32
    %c0_i32_224 = arith.constant 0 : i32
    %c0_i32_225 = arith.constant 0 : i32
    %350 = tpu.memref_slice %arg11[%c2_i32_223, %c0_i32_224, %c0_i32_225] : memref<3x64x64xf32, #tpu.memory_space<vmem>> -> memref<1x64x64xf32, #tpu.memory_space<vmem>>
    %351 = tpu.memref_squeeze %350 : memref<1x64x64xf32, #tpu.memory_space<vmem>> -> memref<64x64xf32, #tpu.memory_space<vmem>>
    %c48_226 = arith.constant 48 : index
    %c0_227 = arith.constant 0 : index
    %352 = vector.load %351[%c48_226, %c0_227] : memref<64x64xf32, #tpu.memory_space<vmem>>, vector<8x64xf32>
    %353 = arith.mulf %340, %331 : vector<8x64xf32>
    %354 = arith.addf %352, %353 : vector<8x64xf32>
    %355 = math.tanh %354 : vector<8x64xf32>
    %356 = arith.subf %319, %355 : vector<8x64xf32>
    %357 = arith.mulf %349, %356 : vector<8x64xf32>
    %358 = arith.addf %355, %357 : vector<8x64xf32>
    %cst_228 = arith.constant 0.000000e+00 : f32
    %359 = vector.broadcast %cst_228 : f32 to vector<8x64xf32>
    %360 = arith.select %322, %358, %359 : vector<8x64xi1>, vector<8x64xf32>
    %361 = vector.extract_strided_slice %360 {offsets = [0, 0], sizes = [8, 32], strides = [1, 1]} : vector<8x64xf32> to vector<8x32xf32>
    %c48_229 = arith.constant 48 : index
    %c0_230 = arith.constant 0 : index
    %362 = vector.load %arg12[%c48_229, %c0_230] : memref<64x64xf32, #tpu.memory_space<vmem>>, vector<8x32xf32>
    tpu.vector_store %arg12[%c48_229, %c0_230], %361 {strides = array<i32>} : memref<64x64xf32, #tpu.memory_space<vmem>>, vector<8x32xf32>,
    %363 = vector.extract_strided_slice %360 {offsets = [0, 32], sizes = [8, 32], strides = [1, 1]} : vector<8x64xf32> to vector<8x32xf32>
    %c8_231 = arith.constant 8 : index
    %c32_232 = arith.constant 32 : index
    %364 = vector.load %arg12[%c8_231, %c32_232] : memref<64x64xf32, #tpu.memory_space<vmem>>, vector<8x32xf32>
    tpu.vector_store %arg12[%c8_231, %c32_232], %363 {strides = array<i32>} : memref<64x64xf32, #tpu.memory_space<vmem>>, vector<8x32xf32>,
    %365 = arith.select %322, %358, %319 : vector<8x64xi1>, vector<8x64xf32>
    %c56_233 = arith.constant 56 : index
    %c0_234 = arith.constant 0 : index
    %366 = vector.load %arg1[%c56_233, %c0_234] : memref<64x64xf32, #tpu.memory_space<vmem>>, vector<8x64xf32>
    %cst_235 = arith.constant 5.000000e-01 : f32
    %367 = vector.broadcast %cst_235 : f32 to vector<8x64xf32>
    %368 = arith.cmpf ogt, %366, %367 : vector<8x64xf32>
    %cst_236 = arith.constant dense<0.000000e+00> : vector<8x64xf32>
    %369 = tpu.matmul %365, %32, %cst_236 {dimension_numbers = #tpu.dot_dimension_numbers<[1], [0], [0], [1], [0, 0, 1, 1], [], []>} : vector<8x64xf32>, vector<64x64xf32>, vector<8x64xf32> -> vector<8x64xf32>
    %370 = vector.broadcast %38 : vector<1x64xf32> to vector<8x64xf32>
    %371 = arith.addf %369, %370 : vector<8x64xf32>
    %cst_237 = arith.constant dense<0.000000e+00> : vector<8x64xf32>
    %372 = tpu.matmul %365, %34, %cst_237 {dimension_numbers = #tpu.dot_dimension_numbers<[1], [0], [0], [1], [0, 0, 1, 1], [], []>} : vector<8x64xf32>, vector<64x64xf32>, vector<8x64xf32> -> vector<8x64xf32>
    %373 = vector.broadcast %40 : vector<1x64xf32> to vector<8x64xf32>
    %374 = arith.addf %372, %373 : vector<8x64xf32>
    %cst_238 = arith.constant dense<0.000000e+00> : vector<8x64xf32>
    %375 = tpu.matmul %365, %36, %cst_238 {dimension_numbers = #tpu.dot_dimension_numbers<[1], [0], [0], [1], [0, 0, 1, 1], [], []>} : vector<8x64xf32>, vector<64x64xf32>, vector<8x64xf32> -> vector<8x64xf32>
    %376 = vector.broadcast %42 : vector<1x64xf32> to vector<8x64xf32>
    %377 = arith.addf %375, %376 : vector<8x64xf32>
    %c0_i32_239 = arith.constant 0 : i32
    %c0_i32_240 = arith.constant 0 : i32
    %c0_i32_241 = arith.constant 0 : i32
    %378 = tpu.memref_slice %arg11[%c0_i32_239, %c0_i32_240, %c0_i32_241] : memref<3x64x64xf32, #tpu.memory_space<vmem>> -> memref<1x64x64xf32, #tpu.memory_space<vmem>>
    %379 = tpu.memref_squeeze %378 : memref<1x64x64xf32, #tpu.memory_space<vmem>> -> memref<64x64xf32, #tpu.memory_space<vmem>>
    %c56_242 = arith.constant 56 : index
    %c0_243 = arith.constant 0 : index
    %380 = vector.load %379[%c56_242, %c0_243] : memref<64x64xf32, #tpu.memory_space<vmem>>, vector<8x64xf32>
    %381 = arith.addf %380, %371 : vector<8x64xf32>
    %382 = arith.negf %381 : vector<8x64xf32>
    %383 = math.exp %382 : vector<8x64xf32>
    %cst_244 = arith.constant 1.000000e+00 : f32
    %384 = vector.broadcast %cst_244 : f32 to vector<8x64xf32>
    %385 = arith.addf %384, %383 : vector<8x64xf32>
    %386 = arith.divf %384, %385 : vector<8x64xf32>
    %c1_i32_245 = arith.constant 1 : i32
    %c0_i32_246 = arith.constant 0 : i32
    %c0_i32_247 = arith.constant 0 : i32
    %387 = tpu.memref_slice %arg11[%c1_i32_245, %c0_i32_246, %c0_i32_247] : memref<3x64x64xf32, #tpu.memory_space<vmem>> -> memref<1x64x64xf32, #tpu.memory_space<vmem>>
    %388 = tpu.memref_squeeze %387 : memref<1x64x64xf32, #tpu.memory_space<vmem>> -> memref<64x64xf32, #tpu.memory_space<vmem>>
    %c56_248 = arith.constant 56 : index
    %c0_249 = arith.constant 0 : index
    %389 = vector.load %388[%c56_248, %c0_249] : memref<64x64xf32, #tpu.memory_space<vmem>>, vector<8x64xf32>
    %390 = arith.addf %389, %374 : vector<8x64xf32>
    %391 = arith.negf %390 : vector<8x64xf32>
    %392 = math.exp %391 : vector<8x64xf32>
    %cst_250 = arith.constant 1.000000e+00 : f32
    %393 = vector.broadcast %cst_250 : f32 to vector<8x64xf32>
    %394 = arith.addf %393, %392 : vector<8x64xf32>
    %395 = arith.divf %393, %394 : vector<8x64xf32>
    %c2_i32_251 = arith.constant 2 : i32
    %c0_i32_252 = arith.constant 0 : i32
    %c0_i32_253 = arith.constant 0 : i32
    %396 = tpu.memref_slice %arg11[%c2_i32_251, %c0_i32_252, %c0_i32_253] : memref<3x64x64xf32, #tpu.memory_space<vmem>> -> memref<1x64x64xf32, #tpu.memory_space<vmem>>
    %397 = tpu.memref_squeeze %396 : memref<1x64x64xf32, #tpu.memory_space<vmem>> -> memref<64x64xf32, #tpu.memory_space<vmem>>
    %c56_254 = arith.constant 56 : index
    %c0_255 = arith.constant 0 : index
    %398 = vector.load %397[%c56_254, %c0_255] : memref<64x64xf32, #tpu.memory_space<vmem>>, vector<8x64xf32>
    %399 = arith.mulf %386, %377 : vector<8x64xf32>
    %400 = arith.addf %398, %399 : vector<8x64xf32>
    %401 = math.tanh %400 : vector<8x64xf32>
    %402 = arith.subf %365, %401 : vector<8x64xf32>
    %403 = arith.mulf %395, %402 : vector<8x64xf32>
    %404 = arith.addf %401, %403 : vector<8x64xf32>
    %cst_256 = arith.constant 0.000000e+00 : f32
    %405 = vector.broadcast %cst_256 : f32 to vector<8x64xf32>
    %406 = arith.select %368, %404, %405 : vector<8x64xi1>, vector<8x64xf32>
    %407 = vector.extract_strided_slice %406 {offsets = [0, 0], sizes = [8, 32], strides = [1, 1]} : vector<8x64xf32> to vector<8x32xf32>
    %c56_257 = arith.constant 56 : index
    %c0_258 = arith.constant 0 : index
    %408 = vector.load %arg12[%c56_257, %c0_258] : memref<64x64xf32, #tpu.memory_space<vmem>>, vector<8x32xf32>
    tpu.vector_store %arg12[%c56_257, %c0_258], %407 {strides = array<i32>} : memref<64x64xf32, #tpu.memory_space<vmem>>, vector<8x32xf32>,
    %409 = vector.extract_strided_slice %406 {offsets = [0, 32], sizes = [8, 32], strides = [1, 1]} : vector<8x64xf32> to vector<8x32xf32>
    %c0_259 = arith.constant 0 : index
    %c32_260 = arith.constant 32 : index
    %410 = vector.load %arg12[%c0_259, %c32_260] : memref<64x64xf32, #tpu.memory_space<vmem>>, vector<8x32xf32>
    tpu.vector_store %arg12[%c0_259, %c32_260], %409 {strides = array<i32>} : memref<64x64xf32, #tpu.memory_space<vmem>>, vector<8x32xf32>,
    %c0_261 = arith.constant 0 : index
    %c0_262 = arith.constant 0 : index
    %411 = vector.load %arg12[%c0_261, %c0_262] : memref<64x64xf32, #tpu.memory_space<vmem>>, vector<64x64xf32>
    %c0_263 = arith.constant 0 : index
    %c0_264 = arith.constant 0 : index
    %412 = vector.load %arg6[%c0_263, %c0_264] : memref<64x64xf32, #tpu.memory_space<vmem>>, vector<64x64xf32>
    %cst_265 = arith.constant dense<0.000000e+00> : vector<64x64xf32>
    %413 = tpu.matmul %411, %412, %cst_265 {dimension_numbers = #tpu.dot_dimension_numbers<[1], [0], [0], [1], [0, 0, 1, 1], [], []>} : vector<64x64xf32>, vector<64x64xf32>, vector<64x64xf32> -> vector<64x64xf32>
    %c0_266 = arith.constant 0 : index
    %c0_267 = arith.constant 0 : index
    %414 = vector.load %arg7[%c0_266, %c0_267] : memref<1x64xf32, #tpu.memory_space<vmem>>, vector<1x64xf32>
    %415 = vector.broadcast %414 : vector<1x64xf32> to vector<64x64xf32>
    %416 = arith.addf %413, %415 : vector<64x64xf32>
    %417 = math.tanh %416 : vector<64x64xf32>
    %c0_268 = arith.constant 0 : index
    %c0_269 = arith.constant 0 : index
    %418 = vector.load %arg8[%c0_268, %c0_269] : memref<64x128xf32, #tpu.memory_space<vmem>>, vector<64x128xf32>
    %cst_270 = arith.constant dense<0.000000e+00> : vector<64x128xf32>
    %419 = tpu.matmul %417, %418, %cst_270 {dimension_numbers = #tpu.dot_dimension_numbers<[1], [0], [0], [1], [0, 0, 1, 1], [], []>} : vector<64x64xf32>, vector<64x128xf32>, vector<64x128xf32> -> vector<64x128xf32>
    %c0_271 = arith.constant 0 : index
    %c0_272 = arith.constant 0 : index
    %420 = vector.load %arg9[%c0_271, %c0_272] : memref<1x128xf32, #tpu.memory_space<vmem>>, vector<1x128xf32>
    %421 = vector.broadcast %420 : vector<1x128xf32> to vector<64x128xf32>
    %422 = arith.addf %419, %421 : vector<64x128xf32>
    %423 = tpu.concatenate %411, %411 in 1 : vector<64x64xf32>, vector<64x64xf32> -> vector<64x128xf32>
    %424 = vector.extract_strided_slice %422 {offsets = [0, 0], sizes = [8, 128], strides = [1, 1]} : vector<64x128xf32> to vector<8x128xf32>
    %425 = vector.extract_strided_slice %422 {offsets = [8, 0], sizes = [8, 128], strides = [1, 1]} : vector<64x128xf32> to vector<8x128xf32>
    %426 = arith.maximumf %424, %425 : vector<8x128xf32>
    %427 = vector.extract_strided_slice %422 {offsets = [16, 0], sizes = [8, 128], strides = [1, 1]} : vector<64x128xf32> to vector<8x128xf32>
    %428 = arith.maximumf %426, %427 : vector<8x128xf32>
    %429 = vector.extract_strided_slice %422 {offsets = [24, 0], sizes = [8, 128], strides = [1, 1]} : vector<64x128xf32> to vector<8x128xf32>
    %430 = arith.maximumf %428, %429 : vector<8x128xf32>
    %431 = vector.extract_strided_slice %422 {offsets = [32, 0], sizes = [8, 128], strides = [1, 1]} : vector<64x128xf32> to vector<8x128xf32>
    %432 = arith.maximumf %430, %431 : vector<8x128xf32>
    %433 = vector.extract_strided_slice %422 {offsets = [40, 0], sizes = [8, 128], strides = [1, 1]} : vector<64x128xf32> to vector<8x128xf32>
    %434 = arith.maximumf %432, %433 : vector<8x128xf32>
    %435 = vector.extract_strided_slice %422 {offsets = [48, 0], sizes = [8, 128], strides = [1, 1]} : vector<64x128xf32> to vector<8x128xf32>
    %436 = arith.maximumf %434, %435 : vector<8x128xf32>
    %437 = vector.extract_strided_slice %422 {offsets = [56, 0], sizes = [8, 128], strides = [1, 1]} : vector<64x128xf32> to vector<8x128xf32>
    %438 = arith.maximumf %436, %437 : vector<8x128xf32>
    %cst_273 = arith.constant 0.000000e+00 : f32
    %439 = vector.broadcast %cst_273 : f32 to vector<8x128xf32>
    %cst_274 = arith.constant 0.000000e+00 : f32
    %440 = vector.broadcast %cst_274 : f32 to vector<8x128xf32>
    %441 = vector.extract_strided_slice %422 {offsets = [0, 0], sizes = [8, 128], strides = [1, 1]} : vector<64x128xf32> to vector<8x128xf32>
    %442 = arith.subf %441, %438 : vector<8x128xf32>
    %443 = math.exp %442 : vector<8x128xf32>
    %444 = arith.addf %439, %443 : vector<8x128xf32>
    %445 = vector.extract_strided_slice %423 {offsets = [0, 0], sizes = [8, 128], strides = [1, 1]} : vector<64x128xf32> to vector<8x128xf32>
    %446 = arith.mulf %443, %445 : vector<8x128xf32>
    %447 = arith.addf %440, %446 : vector<8x128xf32>
    %448 = vector.extract_strided_slice %422 {offsets = [8, 0], sizes = [8, 128], strides = [1, 1]} : vector<64x128xf32> to vector<8x128xf32>
    %449 = arith.subf %448, %438 : vector<8x128xf32>
    %450 = math.exp %449 : vector<8x128xf32>
    %451 = arith.addf %444, %450 : vector<8x128xf32>
    %452 = vector.extract_strided_slice %423 {offsets = [8, 0], sizes = [8, 128], strides = [1, 1]} : vector<64x128xf32> to vector<8x128xf32>
    %453 = arith.mulf %450, %452 : vector<8x128xf32>
    %454 = arith.addf %447, %453 : vector<8x128xf32>
    %455 = vector.extract_strided_slice %422 {offsets = [16, 0], sizes = [8, 128], strides = [1, 1]} : vector<64x128xf32> to vector<8x128xf32>
    %456 = arith.subf %455, %438 : vector<8x128xf32>
    %457 = math.exp %456 : vector<8x128xf32>
    %458 = arith.addf %451, %457 : vector<8x128xf32>
    %459 = vector.extract_strided_slice %423 {offsets = [16, 0], sizes = [8, 128], strides = [1, 1]} : vector<64x128xf32> to vector<8x128xf32>
    %460 = arith.mulf %457, %459 : vector<8x128xf32>
    %461 = arith.addf %454, %460 : vector<8x128xf32>
    %462 = vector.extract_strided_slice %422 {offsets = [24, 0], sizes = [8, 128], strides = [1, 1]} : vector<64x128xf32> to vector<8x128xf32>
    %463 = arith.subf %462, %438 : vector<8x128xf32>
    %464 = math.exp %463 : vector<8x128xf32>
    %465 = arith.addf %458, %464 : vector<8x128xf32>
    %466 = vector.extract_strided_slice %423 {offsets = [24, 0], sizes = [8, 128], strides = [1, 1]} : vector<64x128xf32> to vector<8x128xf32>
    %467 = arith.mulf %464, %466 : vector<8x128xf32>
    %468 = arith.addf %461, %467 : vector<8x128xf32>
    %469 = vector.extract_strided_slice %422 {offsets = [32, 0], sizes = [8, 128], strides = [1, 1]} : vector<64x128xf32> to vector<8x128xf32>
    %470 = arith.subf %469, %438 : vector<8x128xf32>
    %471 = math.exp %470 : vector<8x128xf32>
    %472 = arith.addf %465, %471 : vector<8x128xf32>
    %473 = vector.extract_strided_slice %423 {offsets = [32, 0], sizes = [8, 128], strides = [1, 1]} : vector<64x128xf32> to vector<8x128xf32>
    %474 = arith.mulf %471, %473 : vector<8x128xf32>
    %475 = arith.addf %468, %474 : vector<8x128xf32>
    %476 = vector.extract_strided_slice %422 {offsets = [40, 0], sizes = [8, 128], strides = [1, 1]} : vector<64x128xf32> to vector<8x128xf32>
    %477 = arith.subf %476, %438 : vector<8x128xf32>
    %478 = math.exp %477 : vector<8x128xf32>
    %479 = arith.addf %472, %478 : vector<8x128xf32>
    %480 = vector.extract_strided_slice %423 {offsets = [40, 0], sizes = [8, 128], strides = [1, 1]} : vector<64x128xf32> to vector<8x128xf32>
    %481 = arith.mulf %478, %480 : vector<8x128xf32>
    %482 = arith.addf %475, %481 : vector<8x128xf32>
    %483 = vector.extract_strided_slice %422 {offsets = [48, 0], sizes = [8, 128], strides = [1, 1]} : vector<64x128xf32> to vector<8x128xf32>
    %484 = arith.subf %483, %438 : vector<8x128xf32>
    %485 = math.exp %484 : vector<8x128xf32>
    %486 = arith.addf %479, %485 : vector<8x128xf32>
    %487 = vector.extract_strided_slice %423 {offsets = [48, 0], sizes = [8, 128], strides = [1, 1]} : vector<64x128xf32> to vector<8x128xf32>
    %488 = arith.mulf %485, %487 : vector<8x128xf32>
    %489 = arith.addf %482, %488 : vector<8x128xf32>
    %490 = vector.extract_strided_slice %422 {offsets = [56, 0], sizes = [8, 128], strides = [1, 1]} : vector<64x128xf32> to vector<8x128xf32>
    %491 = arith.subf %490, %438 : vector<8x128xf32>
    %492 = math.exp %491 : vector<8x128xf32>
    %493 = arith.addf %486, %492 : vector<8x128xf32>
    %494 = vector.extract_strided_slice %423 {offsets = [56, 0], sizes = [8, 128], strides = [1, 1]} : vector<64x128xf32> to vector<8x128xf32>
    %495 = arith.mulf %492, %494 : vector<8x128xf32>
    %496 = arith.addf %489, %495 : vector<8x128xf32>
    %497 = arith.divf %496, %493 : vector<8x128xf32>
    %498 = arith.mulf %497, %497 : vector<8x128xf32>
    %cst_275 = arith.constant dense<0.000000e+00> : vector<8xf32>
    %499 = vector.multi_reduction <add>, %498, %cst_275 [1] : vector<8x128xf32> to vector<8xf32>
    %500 = vector.shape_cast %499 : vector<8xf32> to vector<8x1xf32>
    %501 = math.sqrt %500 : vector<8x1xf32>
    %cst_276 = arith.constant 9.99999996E-13 : f32
    %502 = vector.broadcast %cst_276 : f32 to vector<8x1xf32>
    %503 = arith.maximumf %501, %502 : vector<8x1xf32>
    %504 = vector.broadcast %503 : vector<8x1xf32> to vector<8x128xf32>
    %505 = arith.divf %497, %504 : vector<8x128xf32>
    %c0_277 = arith.constant 0 : index
    %c0_278 = arith.constant 0 : index
    %506 = vector.load %arg10[%c0_277, %c0_278] : memref<8x128xf32, #tpu.memory_space<vmem>>, vector<8x128xf32>
    tpu.vector_store %arg10[%c0_277, %c0_278], %505 {strides = array<i32>} : memref<8x128xf32, #tpu.memory_space<vmem>>, vector<8x128xf32>,
    return
  }
}

</mosaic_0001>

<bundles_post_ra>
// kernel: text_rnn_encoder_forward.1
= control target key start
LH: loop header
LB: loop body
LE: loop exit
PB: predicated region body
PF: predicated region fallthrough
CT: control target
= control target key end

     0   :  { %vm58_vm0 = vcmask 523264   ;;  %v4366_v34 = vmov 0.0|0.0   ;;  %vm4367_vm1 = vmmov 0   ;;  %vm746_vm3 = vcmask 261120   ;;  %s5233_s2 = inlined_call_operand.vmem [shape: f32[3,64,64], index: 2, kind: input, shape index: {}]   ;;  %s5234_s0 = inlined_call_operand.vmem [shape: f32[64,64], index: 0, kind: input, shape index: {}]   ;;  %s5235_s4 = inlined_call_operand.vmem [shape: f32[3,64,64], index: 4, kind: input, shape index: {}]   ;;  %s5236_s3 = inlined_call_operand.vmem [shape: f32[3,1,64], index: 3, kind: input, shape index: {}]   ;;  %s5237_s5 = inlined_call_operand.vmem [shape: f32[3,1,64], index: 5, kind: input, shape index: {}]   ;;  %s5238_s1 = inlined_call_operand.vmem [shape: f32[64,64], index: 1, kind: input, shape index: {}]   ;;  %s5239_s6 = inlined_call_operand.vmem [shape: f32[64,64], index: 6, kind: input, shape index: {}]   ;;  %s5240_s8 = inlined_call_operand.vmem [shape: f32[64,128], index: 8, kind: input, shape index: {}]   ;;  %s5241_s7 = inlined_call_operand.vmem [shape: f32[1,64], index: 7, kind: input, shape index: {}]   ;;  %s5242_s9 = inlined_call_operand.vmem [shape: f32[1,128], index: 9, kind: input, shape index: {}]   ;;  %s5243_s10 = inlined_call_operand.vmem [shape: f32[8,128], index: 10, kind: output, shape index: {}]  }
   0x1   :  { %v43_v0 = vld [vmem:[%s5233_s2] sm:$0xff]  ;;  %v44_v1 = vld [vmem:[%s5233_s2 + $0x8] sm:$0xff]  ;;  %v45_v5 = vld [vmem:[%s5233_s2 + $0x10] sm:$0xff]  ;;  %vm748_vm4 = vcmask 523520  }
   0x2   :  { %v2863_v2 = vld [vmem:[%s5233_s2 + $0x40] sm:$0xff]  ;;  %v3867_v3 = vpack.c.bf16 %v44_v1, %v43_v0  ;;  %v2864_v4 = vld [vmem:[%s5233_s2 + $0x48] sm:$0xff]  ;;  %v46_v6 = vld [vmem:[%s5233_s2 + $0x18] sm:$0xff]  ;;  %v4368_v0 = vmov 0.0  }
   0x3   :  { %v3883_v7 = vpack.c.bf16 %v2864_v4, %v2863_v2  ;;  %v3871_v8 = vpack.c.bf16 %v46_v6, %v45_v5  ;;  %v2865_v9 = vld [vmem:[%s5233_s2 + $0x50] sm:$0xff]  ;;  %v2866_v10 = vld [vmem:[%s5233_s2 + $0x58] sm:$0xff]  ;;  %v47_v11 = vld [vmem:[%s5233_s2 + $0x20] sm:$0xff] }
   0x4   :  { %3868 = vmatprep.subr.bf16.mxu0 %v3867_v3  ;;  %v3887_v12 = vpack.c.bf16 %v2866_v10, %v2865_v9  ;;  %v48_v13 = vld [vmem:[%s5233_s2 + $0x28] sm:$0xff]  ;;  %v2867_v14 = vld [vmem:[%s5233_s2 + $0x60] sm:$0xff]  ;;  %v49_v19 = vld [vmem:[%s5233_s2 + $0x30] sm:$0xff] }
   0x5   :  { %v2868_v15 = vld [vmem:[%s5233_s2 + $0x68] sm:$0xff]  ;;  %3884 = vmatprep.subr.bf16.mxu1 %v3883_v7  ;;  %3870 = vmatpush3.bf16.msra.mxu0 %v3867_v3  ;;  %v3875_v16 = vpack.c.bf16 %v48_v13, %v47_v11  ;;  %v4464_v17 = vld [vmem:[%s5234_s0] sm:$0xff]  ;;  %v50_v20 = vld [vmem:[%s5233_s2 + $0x38] sm:$0xff] }
   0x6   :  { %3886 = vmatpush3.bf16.msra.mxu1 %v3883_v7  ;;  %3872 = vmatprep.subr.bf16.mxu0 %v3871_v8  ;;  %v3891_v18 = vpack.c.bf16 %v2868_v15, %v2867_v14  ;;  %v2869_v21 = vld [vmem:[%s5233_s2 + $0x70] sm:$0xff]  ;;  %v2870_v22 = vld [vmem:[%s5233_s2 + $0x78] sm:$0xff]  ;;  %v3879_v23 = vpack.c.bf16 %v50_v20, %v49_v19  ;;  %v2881_v25 = vld [vmem:[%s5233_s2 + $0x80] sm:$0xff] }
   0x7   :  { %3888 = vmatprep.subr.bf16.mxu1 %v3887_v12  ;;  %3287 = vmatprep.mubr.msk.f32.mxu0 %vm58_vm0, %v4464_v17  ;;  %v3895_v24 = vpack.c.bf16 %v2870_v22, %v2869_v21  ;;  %v2882_v26 = vld [vmem:[%s5233_s2 + $0x88] sm:$0xff]  ;;  %v458_v28 = vld [vmem:[%s5235_s4] sm:$0xff]  ;;  %v2883_v30 = vld [vmem:[%s5233_s2 + $0x90] sm:$0xff] }
   0x8   :  { %3315 = vmatprep.mubr.msk.f32.mxu1 %vm58_vm0, %v4464_v17  ;;  %v3899_v27 = vpack.c.bf16 %v2882_v26, %v2881_v25  ;;  %v459_v29 = vld [vmem:[%s5235_s4 + $0x8] sm:$0xff]  ;;  %v2884_v31 = vld [vmem:[%s5233_s2 + $0x98] sm:$0xff]  ;;  %v4511_v35 = vld [vmem:[%s5234_s0 + $0x10] sm:$0xff] }
   0x9   :  { %3874 = vmatpush3.bf16.msra.mxu0 %v3871_v8  ;;  %v4503_v32 = vld [vmem:[%s5234_s0 + $0x8] sm:$0xff]  ;;  %v4505_v33 = vpack.c.bf16 %v459_v29, %v458_v28  ;;  %v3903_v36 = vpack.c.bf16 %v2884_v31, %v2883_v30  ;;  %v460_v37 = vld [vmem:[%s5235_s4 + $0x10] sm:$0xff]  ;;  %v461_v38 = vld [vmem:[%s5235_s4 + $0x18] sm:$0xff] }
   0xa   :  { %3890 = vmatpush3.bf16.msra.mxu1 %v3887_v12  ;;  %3876 = vmatprep.subr.bf16.mxu0 %v3875_v16  ;;  %v2885_v39 = vld [vmem:[%s5233_s2 + $0xa0] sm:$0xff]  ;;  %v2886_v40 = vld [vmem:[%s5233_s2 + $0xa8] sm:$0xff]  ;;  %v4532_v41 = vld [vmem:[%s5234_s0 + $0x18] sm:$0xff]  ;;  %v4537_v42 = vpack.c.bf16 %v461_v38, %v460_v37 }
   0xb   :  { %3892 = vmatprep.subr.bf16.mxu1 %v3891_v18  ;;  %v4544_v43 = vld [vmem:[%s5234_s0 + $0x20] sm:$0xff]  ;;  %v3907_v44 = vpack.c.bf16 %v2886_v40, %v2885_v39  ;;  %v463_v46 = vld [vmem:[%s5235_s4 + $0x28] sm:$0xff]  ;;  %v2887_v47 = vld [vmem:[%s5233_s2 + $0xb0] sm:$0xff] }
   0xc   :  { %v462_v45 = vld [vmem:[%s5235_s4 + $0x20] sm:$0xff]  ;;  %v2888_v48 = vld [vmem:[%s5233_s2 + $0xb8] sm:$0xff]  ;;  %v4566_v49 = vld [vmem:[%s5234_s0 + $0x28] sm:$0xff] }
   0xd   :  { %3878 = vmatpush3.bf16.msra.mxu0 %v3875_v16  ;;  %v4571_v50 = vpack.c.bf16 %v463_v46, %v462_v45  ;;  %v4578_v51 = vld [vmem:[%s5234_s0 + $0x30] sm:$0xff]  ;;  %v3911_v52 = vpack.c.bf16 %v2888_v48, %v2887_v47  ;;  %v465_v54 = vld [vmem:[%s5235_s4 + $0x38] sm:$0xff]  ;;  %v2899_v57 = vld [vmem:[%s5235_s4 + $0x40] sm:$0xff] }
   0xe   :  { %3894 = vmatpush3.bf16.msra.mxu1 %v3891_v18  ;;  %3880 = vmatprep.subr.bf16.mxu0 %v3879_v23  ;;  %v464_v53 = vld [vmem:[%s5235_s4 + $0x30] sm:$0xff]  ;;  %v42_v55 = vld [vmem:[%s5234_s0 + $0x38] sm:$0xff]  ;;  %v2900_v58 = vld [vmem:[%s5235_s4 + $0x48] sm:$0xff] }
   0xf   :  { %3896 = vmatprep.subr.bf16.mxu1 %v3895_v24  ;;  %v4597_v56 = vpack.c.bf16 %v465_v54, %v464_v53  ;;  %v2907_v59 = vld [vmem:[%s5235_s4 + $0x80] sm:$0xff]  ;;  %v2908_v60 = vld [vmem:[%s5235_s4 + $0x88] sm:$0xff]  ;;  %v4616_v61 = vpack.c.bf16 %v2900_v58, %v2899_v57  ;;  %v2901_v62 = vld [vmem:[%s5235_s4 + $0x50] sm:$0xff] }
  0x10   :  { %v2902_v63 = vld [vmem:[%s5235_s4 + $0x58] sm:$0xff]  ;;  %v4630_v1 = vpack.c.bf16 %v2908_v60, %v2907_v59  ;;  %v2909_v2 = vld [vmem:[%s5235_s4 + $0x90] sm:$0xff]  ;;  %v2903_v5 = vld [vmem:[%s5235_s4 + $0x60] sm:$0xff] }
  0x11   :  { %3882 = vmatpush3.bf16.msra.mxu0 %v3879_v23  ;;  %v2910_v3 = vld [vmem:[%s5235_s4 + $0x98] sm:$0xff]  ;;  %v4643_v4 = vpack.c.bf16 %v2902_v63, %v2901_v62  ;;  %v2904_v6 = vld [vmem:[%s5235_s4 + $0x68] sm:$0xff]  ;;  %v2911_v8 = vld [vmem:[%s5235_s4 + $0xa0] sm:$0xff] }
  0x12   :  { %3898 = vmatpush3.bf16.msra.mxu1 %v3895_v24  ;;  %3900 = vmatprep.subr.bf16.mxu0 %v3899_v27  ;;  %v4655_v7 = vpack.c.bf16 %v2910_v3, %v2909_v2  ;;  %v2912_v9 = vld [vmem:[%s5235_s4 + $0xa8] sm:$0xff]  ;;  %v4671_v10 = vpack.c.bf16 %v2904_v6, %v2903_v5  ;;  %v2905_v11 = vld [vmem:[%s5235_s4 + $0x70] sm:$0xff]  ;;  %v2906_v12 = vld [vmem:[%s5235_s4 + $0x78] sm:$0xff] }
  0x13   :  { %3915 = vmatprep.subr.bf16.mxu1 %v4366_v34  ;;  %v4681_v13 = vpack.c.bf16 %v2912_v9, %v2911_v8  ;;  %v2913_v14 = vld [vmem:[%s5235_s4 + $0xb0] sm:$0xff]  ;;  %v2914_v15 = vld [vmem:[%s5235_s4 + $0xb8] sm:$0xff]  ;;  %v4695_v16 = vpack.c.bf16 %v2906_v12, %v2905_v11  ;;  %v2854_v18 = vld [vmem:[%s5236_s3] ss:$0 sm:$0xff]  ;;  %s4369_s4 = smov 64  }
  0x14   :  { %3288 = vmatmul.mubr.msk.f32.vlgmr.msra.gmra.mrb[0].mxu0 %vm58_vm0, %v4503_v32  ;;  %v2872_v19 = vld [vmem:[%s5236_s3 + $0x1] ss:$0 sm:$0xff]  ;;  %v4756_v58 = vld [vmem:[%s5237_s5] ss:$0 sm:$0xff] }
  0x15   :  { %3316 = vmatmul.mubr.msk.f32.vlgmr.msra.gmra.mrb[0].mxu1 %vm58_vm0, %v4503_v32  ;;  %3902 = vmatpush3.bf16.msra.mxu0 %v3899_v27 }
  0x16   :  { %3917 = vmatpush3.bf16.msra.mxu1 %v4505_v33  ;;  %3290 = vmatprep.mubr.msk.f32.mxu0 %vm58_vm0, %v4511_v35 }
  0x17   :  { %3318 = vmatprep.mubr.msk.f32.mxu1 %vm58_vm0, %v4511_v35  ;;  %3904 = vmatprep.subr.bf16.mxu0 %v3903_v36 }
  0x18   :  { %3291 = vmatmul.mubr.msk.f32.gmra.mrb[2].mxu0 %vm58_vm0, %v4532_v41  ;;  %3918 = vmatprep.subr.bf16.mxu1 %v4366_v34 }
  0x19   :  { %3319 = vmatmul.mubr.msk.f32.gmra.mrb[2].mxu1 %vm58_vm0, %v4532_v41  ;;  %3906 = vmatpush3.bf16.msra.mxu0 %v3903_v36 }
  0x1a   :  { %3920 = vmatpush3.bf16.msra.mxu1 %v4537_v42  ;;  %3293 = vmatprep.mubr.msk.f32.mxu0 %vm58_vm0, %v4544_v43 }
  0x1b   :  { %3321 = vmatprep.mubr.msk.f32.mxu1 %vm58_vm0, %v4544_v43  ;;  %3908 = vmatprep.subr.bf16.mxu0 %v3907_v44 }
  0x1c   :  { %3294 = vmatmul.mubr.msk.f32.gmra.mrb[4].mxu0 %vm58_vm0, %v4566_v49  ;;  %3921 = vmatprep.subr.bf16.mxu1 %v4366_v34 }
  0x1d   :  { %3322 = vmatmul.mubr.msk.f32.gmra.mrb[4].mxu1 %vm58_vm0, %v4566_v49  ;;  %3910 = vmatpush3.bf16.msra.mxu0 %v3907_v44 }
  0x1e   :  { %3923 = vmatpush3.bf16.msra.mxu1 %v4571_v50  ;;  %3296 = vmatprep.mubr.msk.f32.mxu0 %vm58_vm0, %v4578_v51 }
  0x1f   :  { %3324 = vmatprep.mubr.msk.f32.mxu1 %vm58_vm0, %v4578_v51  ;;  %3912 = vmatprep.subr.bf16.mxu0 %v3911_v52 }
  0x20   :  { %3297 = vmatmul.mubr.msk.f32.gmra.mrb[6].mxu0 %vm58_vm0, %v42_v55  ;;  %3924 = vmatprep.subr.bf16.mxu1 %v4366_v34 }
  0x21   :  { %3325 = vmatmul.mubr.msk.f32.gmra.mrb[6].mxu1 %vm58_vm0, %v42_v55  ;;  %3914 = vmatpush3.bf16.msra.mxu0 %v3911_v52 }
  0x22   :  { %3926 = vmatpush3.bf16.msra.mxu1 %v4597_v56  ;;  %3343 = vmatprep.mubr.msk.f32.mxu0 %vm58_vm0, %v4464_v17  ;;  %v4699_v17 = vpack.c.bf16 %v2914_v15, %v2913_v14 }
  0x23   :  { %3371 = vmatprep.mubr.msk.f32.mxu1 %vm4367_vm1, %v4368_v0  ;;  %3927 = vmatprep.subr.bf16.mxu0 %v4366_v34 }
  0x24   :  { %3344 = vmatmul.mubr.msk.f32.vlgmr.msra.gmra.mrb[8].mxu0 %vm58_vm0, %v4503_v32  ;;  %3939 = vmatprep.subr.bf16.mxu1 %v4366_v34 }
  0x25   :  { %3372 = vmatmul.mubr.f32.vlgmr.msra.gmra.mrb[8].mxu1 %v4368_v0  ;;  %3929 = vmatpush3.bf16.msra.mxu0 %v4616_v61 }
  0x26   :  { %3346 = vmatprep.mubr.msk.f32.mxu0 %vm58_vm0, %v4511_v35  ;;  %3930 = vmatprep.subr.bf16.mxu0 %v4366_v34 }
  0x27   :  { %3941 = vmatpush3.bf16.msra.mxu1 %v4630_v1  ;;  %3409 = vmatprep.mubr.msk.f32.mxu1 %vm4367_vm1, %v4368_v0 }
  0x28   :  { %3347 = vmatmul.mubr.msk.f32.gmra.mrb[10].mxu0 %vm58_vm0, %v4532_v41  ;;  %3942 = vmatprep.subr.bf16.mxu1 %v4366_v34 }
  0x29   :  { %3932 = vmatpush3.bf16.msra.mxu0 %v4643_v4  ;;  %3349 = vmatprep.mubr.msk.f32.mxu0 %vm58_vm0, %v4544_v43 }
  0x2a   :  { %3933 = vmatprep.subr.bf16.mxu0 %v4366_v34 }
  0x2b   :  { %3944 = vmatpush3.bf16.msra.mxu1 %v4655_v7 }
  0x2c   :  { %3350 = vmatmul.mubr.msk.f32.gmra.mrb[12].mxu0 %vm58_vm0, %v4566_v49  ;;  %3945 = vmatprep.subr.bf16.mxu1 %v4366_v34 }
  0x2d   :  { %3935 = vmatpush3.bf16.msra.mxu0 %v4671_v10  ;;  %3352 = vmatprep.mubr.msk.f32.mxu0 %vm58_vm0, %v4578_v51 }
  0x2e   :  { %3936 = vmatprep.subr.bf16.mxu0 %v4366_v34 }
  0x2f   :  { %3947 = vmatpush3.bf16.msra.mxu1 %v4681_v13 }
  0x30   :  { %3353 = vmatmul.mubr.msk.f32.gmra.mrb[14].mxu0 %vm58_vm0, %v42_v55  ;;  %3948 = vmatprep.subr.bf16.mxu1 %v4366_v34  ;;  %v2890_v55 = vld [vmem:[%s5236_s3 + $0x2] ss:$0 sm:$0xff] }
  0x31   :  { %3938 = vmatpush3.bf16.msra.mxu0 %v4695_v16  ;;  %3390 = vmatprep.mubr.msk.f32.mxu0 %vm4367_vm1, %v4368_v0 }
  0x32   :  { %3951 = vmatprep.subr.bf16.mxu0 %v4366_v34 }
  0x33   :  { %3950 = vmatpush3.bf16.msra.mxu1 %v4699_v17 }
  0x34   :  { %3391 = vmatmul.mubr.f32.vlgmr.msra.gmra.mrb[16].mxu0 %v4368_v0  ;;  %3963 = vmatprep.subr.bf16.mxu1 %v4366_v34 }
  0x35   :  { %3953 = vmatpush3.bf16.msra.mxu0 %v4505_v33  ;;  %3428 = vmatprep.mubr.msk.f32.mxu0 %vm4367_vm1, %v4368_v0 }
  0x36   :  { %3410 = vmatmul.mubr.f32.vlgmr.msra.gmra.mrb[10].mxu1 %v4368_v0  ;;  %3954 = vmatprep.subr.bf16.mxu0 %v4366_v34 }
  0x37   :  { %3965 = vmatpush3.bf16.msra.mxu1 %v4616_v61  ;;  %3447 = vmatprep.mubr.msk.f32.mxu1 %vm4367_vm1, %v4368_v0 }
  0x38   :  { %3966 = vmatprep.subr.bf16.mxu1 %v4366_v34 }
  0x39   :  { %3956 = vmatpush3.bf16.msra.mxu0 %v4537_v42 }
  0x3a   :  { %3957 = vmatprep.subr.bf16.mxu0 %v4366_v34 }
  0x3b   :  { %3968 = vmatpush3.bf16.msra.mxu1 %v4643_v4 }
  0x3c   :  { %3969 = vmatprep.subr.bf16.mxu1 %v4366_v34 }
  0x3d   :  { %3959 = vmatpush3.bf16.msra.mxu0 %v4571_v50 }
  0x3e   :  { %3960 = vmatprep.subr.bf16.mxu0 %v4366_v34 }
  0x3f   :  { %3971 = vmatpush3.bf16.msra.mxu1 %v4671_v10 }
  0x40   :  { %3972 = vmatprep.subr.bf16.mxu1 %v4366_v34 }
  0x41   :  { %3962 = vmatpush3.bf16.msra.mxu0 %v4597_v56 }
  0x42   :  { %3975 = vmatprep.subr.bf16.mxu0 %v4366_v34 }
  0x43   :  { %3974 = vmatpush3.bf16.msra.mxu1 %v4695_v16 }
  0x44   :  { %3987 = vmatprep.subr.bf16.mxu1 %v4366_v34 }
  0xe7   :  { %v3289_v20 = vpop.f32.mrb[0].mxu0 }
  0xe8   :  { %v3317_v21 = vpop.f32.mrb[0].mxu1  ;;  %v155_v22 = vadd.f32 %v3289_v20, %v2854_v18  ;;  %v149_v23 = vpop.f32.mrb[1].mxu0 }
  0xe9   :  { %v285_v24 = vadd.f32 %v3317_v21, %v2872_v19  ;;  %v279_v25 = vpop.f32.mrb[1].mxu1  ;;  %v150_v26 = vadd.f32 %v2854_v18, %v149_v23 }
  0xea   :  { %189 = vst.msk [vmem:[#allocation2 + $0x8] sm:$0xff] %vm58_vm0, %v155_v22  ;;  %v280_v27 = vadd.f32 %v2872_v19, %v279_v25 }
  0xeb   :  { %320 = vst.msk [vmem:[#allocation2 + $0x48] sm:$0xff] %vm58_vm0, %v285_v24  ;;  %188 = vst.msk [vmem:[#allocation2] sm:$0xff] %vm58_vm0, %v150_v26  ;;  %v3292_v28 = vpop.f32.mrb[2].mxu0  ;;  %v4771_v26 = vld [vmem:[%s5237_s5 + $0x1] ss:$0 sm:$0xff] }
  0xec   :  { %319 = vst.msk [vmem:[#allocation2 + $0x40] sm:$0xff] %vm58_vm0, %v280_v27  ;;  %v3320_v29 = vpop.f32.mrb[2].mxu1  ;;  %v165_v30 = vadd.f32 %v3292_v28, %v2854_v18  ;;  %v159_v31 = vpop.f32.mrb[3].mxu0 }
  0xed   :  { %v295_v32 = vadd.f32 %v3320_v29, %v2872_v19  ;;  %v289_v35 = vpop.f32.mrb[3].mxu1  ;;  %v160_v36 = vadd.f32 %v2854_v18, %v159_v31 }
  0xee   :  { %191 = vst.msk [vmem:[#allocation2 + $0x18] sm:$0xff] %vm58_vm0, %v165_v30  ;;  %v290_v37 = vadd.f32 %v2872_v19, %v289_v35 }
  0xef   :  { %322 = vst.msk [vmem:[#allocation2 + $0x58] sm:$0xff] %vm58_vm0, %v295_v32  ;;  %190 = vst.msk [vmem:[#allocation2 + $0x10] sm:$0xff] %vm58_vm0, %v160_v36  ;;  %v3295_v38 = vpop.f32.mrb[4].mxu0 }
  0xf0   :  { %321 = vst.msk [vmem:[#allocation2 + $0x50] sm:$0xff] %vm58_vm0, %v290_v37  ;;  %v3323_v39 = vpop.f32.mrb[4].mxu1  ;;  %v175_v40 = vadd.f32 %v3295_v38, %v2854_v18  ;;  %v169_v41 = vpop.f32.mrb[5].mxu0 }
  0xf1   :  { %v305_v43 = vadd.f32 %v3323_v39, %v2872_v19  ;;  %v299_v44 = vpop.f32.mrb[5].mxu1  ;;  %v170_v45 = vadd.f32 %v2854_v18, %v169_v41  ;;  %v4779_v39 = vld [vmem:[%s5237_s5 + $0x2] ss:$0 sm:$0xff] }
  0xf2   :  { %193 = vst.msk [vmem:[#allocation2 + $0x28] sm:$0xff] %vm58_vm0, %v175_v40  ;;  %v300_v46 = vadd.f32 %v2872_v19, %v299_v44  ;;  %v722_v6 = vld [vmem:[#allocation2] sm:$0xff] }
  0xf3   :  { %324 = vst.msk [vmem:[#allocation2 + $0x68] sm:$0xff] %vm58_vm0, %v305_v43  ;;  %192 = vst.msk [vmem:[#allocation2 + $0x20] sm:$0xff] %vm58_vm0, %v170_v45  ;;  %v3298_v47 = vpop.f32.mrb[6].mxu0  ;;  %v730_v31 = vld [vmem:[#allocation2 + $0x40] sm:$0xff] }
  0xf4   :  { %323 = vst.msk [vmem:[#allocation2 + $0x60] sm:$0xff] %vm58_vm0, %v300_v46  ;;  %v3326_v48 = vpop.f32.mrb[6].mxu1  ;;  %v185_v49 = vadd.f32 %v3298_v47, %v2854_v18  ;;  %v179_v51 = vpop.f32.mrb[7].mxu0 }
  0xf5   :  { %v315_v52 = vadd.f32 %v3326_v48, %v2872_v19  ;;  %v309_v53 = vpop.f32.mrb[7].mxu1  ;;  %v180_v54 = vadd.f32 %v2854_v18, %v179_v51 }
  0xf6   :  { %195 = vst.msk [vmem:[#allocation2 + $0x38] sm:$0xff] %vm58_vm0, %v185_v49  ;;  %v310_v57 = vadd.f32 %v2872_v19, %v309_v53 }
  0xf7   :  { %326 = vst.msk [vmem:[#allocation2 + $0x78] sm:$0xff] %vm58_vm0, %v315_v52  ;;  %194 = vst.msk [vmem:[#allocation2 + $0x30] sm:$0xff] %vm58_vm0, %v180_v54  ;;  %v3345_v59 = vpop.f32.mrb[8].mxu0  ;;  %v489_v52 = vld [vmem:[%s5238_s1] sm:$0xff] }
  0xf8   :  { %325 = vst.msk [vmem:[#allocation2 + $0x70] sm:$0xff] %vm58_vm0, %v310_v57  ;;  %v566_v60 = vpop.f32.mrb[8].mxu1  ;;  %v416_v62 = vadd.f32 %v3345_v59, %v2890_v55  ;;  %v410_v63 = vpop.f32.mrb[9].mxu0  ;;  %vm490_vm2 = vcmp.gt.f32.partialorder %v489_v52, 0.5 }
  0xf9   :  { %v567_v2 = vadd.f32 %v4756_v58, %v566_v60  ;;  %v3373_v3 = vpop.f32.mrb[9].mxu1  ;;  %v411_v5 = vadd.f32 %v2890_v55, %v410_v63 }
  0xfa   :  { %451 = vst.msk [vmem:[#allocation2 + $0x88] sm:$0xff] %vm58_vm0, %v416_v62 }
  0xfb   :  { %v723_v8 = vadd.f32 %v722_v6, %v567_v2  ;;  %450 = vst.msk [vmem:[#allocation2 + $0x80] sm:$0xff] %vm58_vm0, %v411_v5  ;;  %v3348_v9 = vpop.f32.mrb[10].mxu0  ;;  %v965_v2 = vld [vmem:[#allocation2 + $0x8] sm:$0xff] }
  0xfc   :  { %v426_v11 = vadd.f32 %v3348_v9, %v2890_v55  ;;  %v420_v12 = vpop.f32.mrb[11].mxu0 }
  0xfd   :  { %v2920_v14 = vmul.f32 -1.442695, %v723_v8  ;;  %v421_v15 = vadd.f32 %v2890_v55, %v420_v12  ;;  %v973_v8 = vld [vmem:[#allocation2 + $0x48] sm:$0xff] }
  0xfe   :  { %453 = vst.msk [vmem:[#allocation2 + $0x98] sm:$0xff] %vm58_vm0, %v426_v11 }
  0xff   :  { %4247 = vpow2.f32 %v2920_v14  ;;  %452 = vst.msk [vmem:[#allocation2 + $0x90] sm:$0xff] %vm58_vm0, %v421_v15  ;;  %v3351_v18 = vpop.f32.mrb[12].mxu0 }
 0x100   :  { %v436_v19 = vadd.f32 %v3351_v18, %v2890_v55  ;;  %v430_v20 = vpop.f32.mrb[13].mxu0 }
 0x101   :  { %v431_v21 = vadd.f32 %v2890_v55, %v430_v20 }
 0x102   :  { %455 = vst.msk [vmem:[#allocation2 + $0xa8] sm:$0xff] %vm58_vm0, %v436_v19  ;;  %v738_v45 = vld [vmem:[#allocation2 + $0x80] sm:$0xff] }
 0x103   :  { %454 = vst.msk [vmem:[#allocation2 + $0xa0] sm:$0xff] %vm58_vm0, %v431_v21  ;;  %v3354_v22 = vpop.f32.mrb[14].mxu0 }
 0x104   :  { %v446_v23 = vadd.f32 %v3354_v22, %v2890_v55  ;;  %v440_v24 = vpop.f32.mrb[15].mxu0 }
 0x105   :  { %v441_v25 = vadd.f32 %v2890_v55, %v440_v24 }
 0x106   :  { %457 = vst.msk [vmem:[#allocation2 + $0xb8] sm:$0xff] %vm58_vm0, %v446_v23  ;;  %v981_v23 = vld [vmem:[#allocation2 + $0x88] sm:$0xff] }
 0x107   :  { %456 = vst.msk [vmem:[#allocation2 + $0xb0] sm:$0xff] %vm58_vm0, %v441_v25  ;;  %v642_v27 = vpop.f32.mrb[16].mxu0 }
 0x108   :  { %v643_v28 = vadd.f32 %v4771_v26, %v642_v27  ;;  %v3392_v29 = vpop.f32.mrb[17].mxu0 }
 0x109   :  { %v4248_v30 = vpop.eup %4247  ;;  %v718_v32 = vpop.f32.mrb[10].mxu1 }
 0x10a   :  { %v727_v35 = vadd.f32 1.0, %v4248_v30  ;;  %v731_v36 = vadd.f32 %v730_v31, %v643_v28  ;;  %v3411_v37 = vpop.f32.mrb[11].mxu1  ;;  %v719_v40 = vadd.f32 %v4779_v39, %v718_v32  ;;  %v750_v28 = vld [vmem:[%s5238_s1 + $0x8] sm:$0xff] }
 0x10b   :  { %vm751_vm5 = vcmp.gt.f32.partialorder %v750_v28, 0.5  ;;  %v1457_v28 = vld [vmem:[#allocation2 + $0x58] sm:$0xff] }
 0x10c   :  { %4249 = vrcp.f32 %v727_v35  ;;  %v2921_v38 = vmul.f32 -1.442695, %v731_v36 }
 0x10e   :  { %4251 = vpow2.f32 %v2921_v38 }
 0x116   :  { %v4250_v41 = vpop.eup %4249 }
 0x117   :  { %v739_v43 = vmul.f32 %v4250_v41, %v719_v40 }
 0x118   :  { %v4252_v44 = vpop.eup %4251 }
 0x119   :  { %v735_v46 = vadd.f32 1.0, %v4252_v44  ;;  %v740_v47 = vadd.f32 %v739_v43, %v738_v45  ;;  %v1207_v44 = vld [vmem:[#allocation2 + $0x10] sm:$0xff] }
 0x11b   :  { %4253 = vrcp.f32 %v735_v46 }
 0x11c   :  { %4255 = vtanh.f32 %v740_v47 }
 0x125   :  { %v4254_v48 = vpop.eup %4253 }
 0x126   :  { %v4256_v49 = vpop.eup %4255 }
 0x127   :  { %v742_v51 = vsub.f32 0.0, %v4256_v49 }
 0x129   :  { %v743_v53 = vmul.f32 %v4254_v48, %v742_v51  ;;  %v1215_v48 = vld [vmem:[#allocation2 + $0x50] sm:$0xff] }
 0x12b   :  { %v744_v54 = vadd.f32 %v4256_v49, %v743_v53 }
 0x12d   :  { %v4785_v55 = vsel %vm490_vm2, %v744_v54, 0.0 }
 0x12e   :  { %3429 = vmatmul.mubr.msk.f32.vlgmr.msra.gmra.mrb[18].mxu0 %vm58_vm0, %v4785_v55  ;;  %3448 = vmatmul.mubr.msk.f32.vlgmr.msra.gmra.mrb[12].mxu1 %vm58_vm0, %v4785_v55  ;;  %747 = vst.msk [vmem:[#allocation3] sm:$0xff] %vm746_vm3, %v4785_v55 }
 0x12f   :  { %749 = vst.msk [vmem:[#allocation3 + $0x38] sm:$0xff] %vm748_vm4, %v4785_v55  ;;  %3977 = vmatpush3.bf16.msra.mxu0 %v4630_v1  ;;  %3466 = vmatprep.mubr.msk.f32.mxu0 %vm4367_vm1, %v4368_v0 }
 0x130   :  { %3978 = vmatprep.subr.bf16.mxu0 %v4366_v34  ;;  %3989 = vmatpush3.bf16.msra.mxu1 %v4505_v33 }
 0x131   :  { %3990 = vmatprep.subr.bf16.mxu1 %v4366_v34  ;;  %3485 = vmatprep.mubr.msk.f32.mxu1 %vm4367_vm1, %v4368_v0 }
 0x133   :  { %3980 = vmatpush3.bf16.msra.mxu0 %v4655_v7 }
 0x134   :  { %3981 = vmatprep.subr.bf16.mxu0 %v4366_v34  ;;  %3992 = vmatpush3.bf16.msra.mxu1 %v4537_v42 }
 0x135   :  { %3993 = vmatprep.subr.bf16.mxu1 %v4366_v34 }
 0x137   :  { %3983 = vmatpush3.bf16.msra.mxu0 %v4681_v13 }
 0x138   :  { %3984 = vmatprep.subr.bf16.mxu0 %v4366_v34  ;;  %3995 = vmatpush3.bf16.msra.mxu1 %v4571_v50 }
 0x139   :  { %3996 = vmatprep.subr.bf16.mxu1 %v4366_v34 }
 0x13b   :  { %3986 = vmatpush3.bf16.msra.mxu0 %v4699_v17 }
 0x13c   :  { %3999 = vmatprep.subr.bf16.mxu0 %v4366_v34  ;;  %3998 = vmatpush3.bf16.msra.mxu1 %v4597_v56 }
 0x13d   :  { %4011 = vmatprep.subr.bf16.mxu1 %v4366_v34 }
 0x13e   :  { %3467 = vmatmul.mubr.msk.f32.vlgmr.msra.gmra.mrb[20].mxu0 %vm58_vm0, %v4785_v55 }
 0x13f   :  { %4001 = vmatpush3.bf16.msra.mxu0 %v4616_v61  ;;  %3504 = vmatprep.mubr.msk.f32.mxu0 %vm4367_vm1, %v4368_v0 }
 0x140   :  { %4002 = vmatprep.subr.bf16.mxu0 %v4366_v34 }
 0x143   :  { %4004 = vmatpush3.bf16.msra.mxu0 %v4643_v4 }
 0x144   :  { %4005 = vmatprep.subr.bf16.mxu0 %v4366_v34 }
 0x147   :  { %4007 = vmatpush3.bf16.msra.mxu0 %v4671_v10 }
 0x148   :  { %4008 = vmatprep.subr.bf16.mxu0 %v4366_v34 }
 0x14b   :  { %4010 = vmatpush3.bf16.msra.mxu0 %v4695_v16 }
 0x14c   :  { %4023 = vmatprep.subr.bf16.mxu0 %v4366_v34 }
 0x201   :  { %v821_v57 = vpop.f32.mrb[18].mxu0  ;;  %v891_v59 = vpop.f32.mrb[12].mxu1 }
 0x202   :  { %v822_v60 = vadd.f32 %v4756_v58, %v821_v57  ;;  %v3430_v62 = vpop.f32.mrb[19].mxu0  ;;  %v3449_v63 = vpop.f32.mrb[13].mxu1  ;;  %v892_v6 = vadd.f32 %v4771_v26, %v891_v59 }
 0x203   :  { %v1223_v63 = vld [vmem:[#allocation2 + $0x90] sm:$0xff] }
 0x204   :  { %v966_v3 = vadd.f32 %v965_v2, %v822_v60  ;;  %v974_v9 = vadd.f32 %v973_v8, %v892_v6  ;;  %v992_v6 = vld [vmem:[%s5238_s1 + $0x10] sm:$0xff] }
 0x205   :  { %vm993_vm6 = vcmp.gt.f32.partialorder %v992_v6, 0.5  ;;  %v1699_v6 = vld [vmem:[#allocation2 + $0x60] sm:$0xff] }
 0x206   :  { %v2925_v5 = vmul.f32 -1.442695, %v966_v3  ;;  %v2926_v11 = vmul.f32 -1.442695, %v974_v9 }
 0x208   :  { %4257 = vpow2.f32 %v2925_v5 }
 0x209   :  { %4259 = vpow2.f32 %v2926_v11 }
 0x211   :  { %v961_v12 = vpop.f32.mrb[20].mxu0 }
 0x212   :  { %v4258_v14 = vpop.eup %4257  ;;  %v3468_v15 = vpop.f32.mrb[21].mxu0  ;;  %v962_v20 = vadd.f32 %v4779_v39, %v961_v12 }
 0x213   :  { %v970_v18 = vadd.f32 1.0, %v4258_v14  ;;  %v4260_v19 = vpop.eup %4259 }
 0x214   :  { %v978_v24 = vadd.f32 1.0, %v4260_v19 }
 0x215   :  { %4261 = vrcp.f32 %v970_v18 }
 0x21f   :  { %v4262_v21 = vpop.eup %4261 }
 0x220   :  { %v982_v22 = vmul.f32 %v4262_v21, %v962_v20 }
 0x222   :  { %v983_v25 = vadd.f32 %v982_v22, %v981_v23  ;;  %v1449_v23 = vld [vmem:[#allocation2 + $0x18] sm:$0xff] }
 0x224   :  { %4263 = vtanh.f32 %v983_v25 }
 0x225   :  { %4265 = vrcp.f32 %v978_v24 }
 0x22e   :  { %v4264_v27 = vpop.eup %4263 }
 0x22f   :  { %v985_v29 = vsub.f32 %v4785_v55, %v4264_v27  ;;  %v4266_v30 = vpop.eup %4265 }
 0x231   :  { %v986_v31 = vmul.f32 %v4266_v30, %v985_v29 }
 0x233   :  { %v987_v32 = vadd.f32 %v4264_v27, %v986_v31 }
 0x235   :  { %v988_v35 = vsel %vm751_vm5, %v987_v32, 0.0  ;;  %v4835_v36 = vsel %vm751_vm5, %v987_v32, %v4785_v55 }
 0x236   :  { %989 = vst.msk [vmem:[#allocation3 + $0x8] sm:$0xff] %vm746_vm3, %v988_v35  ;;  %3486 = vmatmul.mubr.msk.f32.vlgmr.msra.gmra.mrb[14].mxu1 %vm58_vm0, %v4835_v36  ;;  %3505 = vmatmul.mubr.msk.f32.vlgmr.msra.gmra.mrb[22].mxu0 %vm58_vm0, %v4835_v36 }
 0x237   :  { %990 = vst.msk [vmem:[#allocation3 + $0x30] sm:$0xff] %vm748_vm4, %v988_v35  ;;  %4013 = vmatpush3.bf16.msra.mxu1 %v4630_v1  ;;  %3523 = vmatprep.mubr.msk.f32.mxu1 %vm4367_vm1, %v4368_v0 }
 0x238   :  { %4014 = vmatprep.subr.bf16.mxu1 %v4366_v34  ;;  %4025 = vmatpush3.bf16.msra.mxu0 %v4505_v33 }
 0x239   :  { %4026 = vmatprep.subr.bf16.mxu0 %v4366_v34  ;;  %3542 = vmatprep.mubr.msk.f32.mxu0 %vm4367_vm1, %v4368_v0 }
 0x23b   :  { %4016 = vmatpush3.bf16.msra.mxu1 %v4655_v7 }
 0x23c   :  { %4017 = vmatprep.subr.bf16.mxu1 %v4366_v34  ;;  %4028 = vmatpush3.bf16.msra.mxu0 %v4537_v42 }
 0x23d   :  { %4029 = vmatprep.subr.bf16.mxu0 %v4366_v34 }
 0x23f   :  { %4019 = vmatpush3.bf16.msra.mxu1 %v4681_v13 }
 0x240   :  { %4020 = vmatprep.subr.bf16.mxu1 %v4366_v34  ;;  %4031 = vmatpush3.bf16.msra.mxu0 %v4571_v50 }
 0x241   :  { %4032 = vmatprep.subr.bf16.mxu0 %v4366_v34 }
 0x243   :  { %4022 = vmatpush3.bf16.msra.mxu1 %v4699_v17 }
 0x244   :  { %4035 = vmatprep.subr.bf16.mxu1 %v4366_v34  ;;  %4034 = vmatpush3.bf16.msra.mxu0 %v4597_v56 }
 0x245   :  { %4047 = vmatprep.subr.bf16.mxu0 %v4366_v34 }
 0x246   :  { %3524 = vmatmul.mubr.msk.f32.vlgmr.msra.gmra.mrb[16].mxu1 %vm58_vm0, %v4835_v36 }
 0x247   :  { %4037 = vmatpush3.bf16.msra.mxu1 %v4616_v61  ;;  %3561 = vmatprep.mubr.msk.f32.mxu1 %vm4367_vm1, %v4368_v0 }
 0x248   :  { %4038 = vmatprep.subr.bf16.mxu1 %v4366_v34 }
 0x24b   :  { %4040 = vmatpush3.bf16.msra.mxu1 %v4643_v4 }
 0x24c   :  { %4041 = vmatprep.subr.bf16.mxu1 %v4366_v34 }
 0x24f   :  { %4043 = vmatpush3.bf16.msra.mxu1 %v4671_v10 }
 0x250   :  { %4044 = vmatprep.subr.bf16.mxu1 %v4366_v34 }
 0x253   :  { %4046 = vmatpush3.bf16.msra.mxu1 %v4695_v16 }
 0x254   :  { %4059 = vmatprep.subr.bf16.mxu1 %v4366_v34 }
 0x309   :  { %v1063_v37 = vpop.f32.mrb[14].mxu1  ;;  %v1133_v38 = vpop.f32.mrb[22].mxu0 }
 0x30a   :  { %v1064_v40 = vadd.f32 %v4756_v58, %v1063_v37  ;;  %v3487_v41 = vpop.f32.mrb[15].mxu1  ;;  %v3506_v43 = vpop.f32.mrb[23].mxu0  ;;  %v1134_v47 = vadd.f32 %v4771_v26, %v1133_v38 }
 0x30b   :  { %v1465_v43 = vld [vmem:[#allocation2 + $0x98] sm:$0xff] }
 0x30c   :  { %v1208_v45 = vadd.f32 %v1207_v44, %v1064_v40  ;;  %v1216_v49 = vadd.f32 %v1215_v48, %v1134_v47  ;;  %v1234_v47 = vld [vmem:[%s5238_s1 + $0x18] sm:$0xff] }
 0x30d   :  { %vm1235_vm7 = vcmp.gt.f32.partialorder %v1234_v47, 0.5  ;;  %v1941_v47 = vld [vmem:[#allocation2 + $0x68] sm:$0xff] }
 0x30e   :  { %v2930_v46 = vmul.f32 -1.442695, %v1208_v45  ;;  %v2931_v51 = vmul.f32 -1.442695, %v1216_v49 }
 0x310   :  { %4267 = vpow2.f32 %v2930_v46 }
 0x311   :  { %4269 = vpow2.f32 %v2931_v51 }
 0x319   :  { %v1203_v52 = vpop.f32.mrb[16].mxu1 }
 0x31a   :  { %v4268_v53 = vpop.eup %4267  ;;  %v3525_v54 = vpop.f32.mrb[17].mxu1  ;;  %v1204_v59 = vadd.f32 %v4779_v39, %v1203_v52 }
 0x31b   :  { %v1212_v55 = vadd.f32 1.0, %v4268_v53  ;;  %v4270_v57 = vpop.eup %4269 }
 0x31c   :  { %v1220_v2 = vadd.f32 1.0, %v4270_v57 }
 0x31d   :  { %4271 = vrcp.f32 %v1212_v55 }
 0x327   :  { %v4272_v60 = vpop.eup %4271 }
 0x328   :  { %v1224_v62 = vmul.f32 %v4272_v60, %v1204_v59 }
 0x32a   :  { %v1225_v3 = vadd.f32 %v1224_v62, %v1223_v63  ;;  %v1691_v63 = vld [vmem:[#allocation2 + $0x20] sm:$0xff] }
 0x32c   :  { %4273 = vtanh.f32 %v1225_v3 }
 0x32d   :  { %4275 = vrcp.f32 %v1220_v2 }
 0x336   :  { %v4274_v5 = vpop.eup %4273 }
 0x337   :  { %v1227_v8 = vsub.f32 %v4835_v36, %v4274_v5  ;;  %v4276_v9 = vpop.eup %4275 }
 0x339   :  { %v1228_v11 = vmul.f32 %v4276_v9, %v1227_v8 }
 0x33b   :  { %v1229_v12 = vadd.f32 %v4274_v5, %v1228_v11 }
 0x33d   :  { %v1230_v14 = vsel %vm993_vm6, %v1229_v12, 0.0  ;;  %v4883_v15 = vsel %vm993_vm6, %v1229_v12, %v4835_v36 }
 0x33e   :  { %1231 = vst.msk [vmem:[#allocation3 + $0x10] sm:$0xff] %vm746_vm3, %v1230_v14  ;;  %3543 = vmatmul.mubr.msk.f32.vlgmr.msra.gmra.mrb[24].mxu0 %vm58_vm0, %v4883_v15  ;;  %3562 = vmatmul.mubr.msk.f32.vlgmr.msra.gmra.mrb[18].mxu1 %vm58_vm0, %v4883_v15 }
 0x33f   :  { %1232 = vst.msk [vmem:[#allocation3 + $0x28] sm:$0xff] %vm748_vm4, %v1230_v14  ;;  %4049 = vmatpush3.bf16.msra.mxu0 %v4630_v1  ;;  %3580 = vmatprep.mubr.msk.f32.mxu0 %vm4367_vm1, %v4368_v0 }
 0x340   :  { %4050 = vmatprep.subr.bf16.mxu0 %v4366_v34  ;;  %4061 = vmatpush3.bf16.msra.mxu1 %v4505_v33 }
 0x341   :  { %4062 = vmatprep.subr.bf16.mxu1 %v4366_v34  ;;  %3599 = vmatprep.mubr.msk.f32.mxu1 %vm4367_vm1, %v4368_v0 }
 0x343   :  { %4052 = vmatpush3.bf16.msra.mxu0 %v4655_v7 }
 0x344   :  { %4053 = vmatprep.subr.bf16.mxu0 %v4366_v34  ;;  %4064 = vmatpush3.bf16.msra.mxu1 %v4537_v42 }
 0x345   :  { %4065 = vmatprep.subr.bf16.mxu1 %v4366_v34 }
 0x347   :  { %4055 = vmatpush3.bf16.msra.mxu0 %v4681_v13 }
 0x348   :  { %4056 = vmatprep.subr.bf16.mxu0 %v4366_v34  ;;  %4067 = vmatpush3.bf16.msra.mxu1 %v4571_v50 }
 0x349   :  { %4068 = vmatprep.subr.bf16.mxu1 %v4366_v34 }
 0x34b   :  { %4058 = vmatpush3.bf16.msra.mxu0 %v4699_v17 }
 0x34c   :  { %4071 = vmatprep.subr.bf16.mxu0 %v4366_v34  ;;  %4070 = vmatpush3.bf16.msra.mxu1 %v4597_v56 }
 0x34d   :  { %4083 = vmatprep.subr.bf16.mxu1 %v4366_v34 }
 0x34e   :  { %3581 = vmatmul.mubr.msk.f32.vlgmr.msra.gmra.mrb[26].mxu0 %vm58_vm0, %v4883_v15 }
 0x34f   :  { %4073 = vmatpush3.bf16.msra.mxu0 %v4616_v61  ;;  %3618 = vmatprep.mubr.msk.f32.mxu0 %vm4367_vm1, %v4368_v0 }
 0x350   :  { %4074 = vmatprep.subr.bf16.mxu0 %v4366_v34 }
 0x353   :  { %4076 = vmatpush3.bf16.msra.mxu0 %v4643_v4 }
 0x354   :  { %4077 = vmatprep.subr.bf16.mxu0 %v4366_v34 }
 0x357   :  { %4079 = vmatpush3.bf16.msra.mxu0 %v4671_v10 }
 0x358   :  { %4080 = vmatprep.subr.bf16.mxu0 %v4366_v34 }
 0x35b   :  { %4082 = vmatpush3.bf16.msra.mxu0 %v4695_v16 }
 0x35c   :  { %4095 = vmatprep.subr.bf16.mxu0 %v4366_v34 }
 0x411   :  { %v1305_v18 = vpop.f32.mrb[24].mxu0  ;;  %v1375_v19 = vpop.f32.mrb[18].mxu1 }
 0x412   :  { %v1306_v20 = vadd.f32 %v4756_v58, %v1305_v18  ;;  %v3544_v21 = vpop.f32.mrb[25].mxu0  ;;  %v3563_v22 = vpop.f32.mrb[19].mxu1  ;;  %v1376_v27 = vadd.f32 %v4771_v26, %v1375_v19 }
 0x413   :  { %v1707_v22 = vld [vmem:[#allocation2 + $0xa0] sm:$0xff] }
 0x414   :  { %v1450_v24 = vadd.f32 %v1449_v23, %v1306_v20  ;;  %v1458_v29 = vadd.f32 %v1457_v28, %v1376_v27  ;;  %v1476_v27 = vld [vmem:[%s5238_s1 + $0x20] sm:$0xff] }
 0x415   :  { %vm1477_vm8 = vcmp.gt.f32.partialorder %v1476_v27, 0.5 }
 0x416   :  { %v2935_v25 = vmul.f32 -1.442695, %v1450_v24  ;;  %v2936_v30 = vmul.f32 -1.442695, %v1458_v29 }
 0x418   :  { %4277 = vpow2.f32 %v2935_v25 }
 0x419   :  { %4279 = vpow2.f32 %v2936_v30 }
 0x421   :  { %v1445_v31 = vpop.f32.mrb[26].mxu0 }
 0x422   :  { %v4278_v32 = vpop.eup %4277  ;;  %v3582_v35 = vpop.f32.mrb[27].mxu0  ;;  %v1446_v38 = vadd.f32 %v4779_v39, %v1445_v31 }
 0x423   :  { %v1454_v36 = vadd.f32 1.0, %v4278_v32  ;;  %v4280_v37 = vpop.eup %4279 }
 0x424   :  { %v1462_v44 = vadd.f32 1.0, %v4280_v37 }
 0x425   :  { %4281 = vrcp.f32 %v1454_v36 }
 0x42f   :  { %v4282_v40 = vpop.eup %4281 }
 0x430   :  { %v1466_v41 = vmul.f32 %v4282_v40, %v1446_v38 }
 0x432   :  { %v1467_v45 = vadd.f32 %v1466_v41, %v1465_v43  ;;  %v1933_v43 = vld [vmem:[#allocation2 + $0x28] sm:$0xff] }
 0x434   :  { %4283 = vtanh.f32 %v1467_v45 }
 0x435   :  { %4285 = vrcp.f32 %v1462_v44 }
 0x43e   :  { %v4284_v46 = vpop.eup %4283 }
 0x43f   :  { %v1469_v48 = vsub.f32 %v4883_v15, %v4284_v46  ;;  %v4286_v49 = vpop.eup %4285 }
 0x441   :  { %v1470_v51 = vmul.f32 %v4286_v49, %v1469_v48 }
 0x443   :  { %v1471_v52 = vadd.f32 %v4284_v46, %v1470_v51 }
 0x445   :  { %v1472_v53 = vsel %vm1235_vm7, %v1471_v52, 0.0  ;;  %v4931_v54 = vsel %vm1235_vm7, %v1471_v52, %v4883_v15 }
 0x446   :  { %1473 = vst.msk [vmem:[#allocation3 + $0x18] sm:$0xff] %vm746_vm3, %v1472_v53  ;;  %3600 = vmatmul.mubr.msk.f32.vlgmr.msra.gmra.mrb[20].mxu1 %vm58_vm0, %v4931_v54  ;;  %3619 = vmatmul.mubr.msk.f32.vlgmr.msra.gmra.mrb[28].mxu0 %vm58_vm0, %v4931_v54 }
 0x447   :  { %1474 = vst.msk [vmem:[#allocation3 + $0x20] sm:$0xff] %vm748_vm4, %v1472_v53  ;;  %4085 = vmatpush3.bf16.msra.mxu1 %v4630_v1  ;;  %3637 = vmatprep.mubr.msk.f32.mxu1 %vm4367_vm1, %v4368_v0 }
 0x448   :  { %4086 = vmatprep.subr.bf16.mxu1 %v4366_v34  ;;  %4097 = vmatpush3.bf16.msra.mxu0 %v4505_v33 }
 0x449   :  { %4098 = vmatprep.subr.bf16.mxu0 %v4366_v34  ;;  %3656 = vmatprep.mubr.msk.f32.mxu0 %vm4367_vm1, %v4368_v0 }
 0x44b   :  { %4088 = vmatpush3.bf16.msra.mxu1 %v4655_v7 }
 0x44c   :  { %4089 = vmatprep.subr.bf16.mxu1 %v4366_v34  ;;  %4100 = vmatpush3.bf16.msra.mxu0 %v4537_v42 }
 0x44d   :  { %4101 = vmatprep.subr.bf16.mxu0 %v4366_v34 }
 0x44f   :  { %4091 = vmatpush3.bf16.msra.mxu1 %v4681_v13 }
 0x450   :  { %4092 = vmatprep.subr.bf16.mxu1 %v4366_v34  ;;  %4103 = vmatpush3.bf16.msra.mxu0 %v4571_v50 }
 0x451   :  { %4104 = vmatprep.subr.bf16.mxu0 %v4366_v34 }
 0x453   :  { %4094 = vmatpush3.bf16.msra.mxu1 %v4699_v17 }
 0x454   :  { %4107 = vmatprep.subr.bf16.mxu1 %v4366_v34  ;;  %4106 = vmatpush3.bf16.msra.mxu0 %v4597_v56 }
 0x455   :  { %4119 = vmatprep.subr.bf16.mxu0 %v4366_v34 }
 0x456   :  { %3638 = vmatmul.mubr.msk.f32.vlgmr.msra.gmra.mrb[22].mxu1 %vm58_vm0, %v4931_v54 }
 0x457   :  { %4109 = vmatpush3.bf16.msra.mxu1 %v4616_v61  ;;  %3675 = vmatprep.mubr.msk.f32.mxu1 %vm4367_vm1, %v4368_v0 }
 0x458   :  { %4110 = vmatprep.subr.bf16.mxu1 %v4366_v34 }
 0x45b   :  { %4112 = vmatpush3.bf16.msra.mxu1 %v4643_v4 }
 0x45c   :  { %4113 = vmatprep.subr.bf16.mxu1 %v4366_v34 }
 0x45f   :  { %4115 = vmatpush3.bf16.msra.mxu1 %v4671_v10 }
 0x460   :  { %4116 = vmatprep.subr.bf16.mxu1 %v4366_v34 }
 0x463   :  { %4118 = vmatpush3.bf16.msra.mxu1 %v4695_v16 }
 0x464   :  { %4131 = vmatprep.subr.bf16.mxu1 %v4366_v34 }
 0x519   :  { %v1547_v55 = vpop.f32.mrb[20].mxu1  ;;  %v1617_v57 = vpop.f32.mrb[28].mxu0 }
 0x51a   :  { %v1548_v59 = vadd.f32 %v4756_v58, %v1547_v55  ;;  %v3601_v60 = vpop.f32.mrb[21].mxu1  ;;  %v3620_v62 = vpop.f32.mrb[29].mxu0  ;;  %v1618_v5 = vadd.f32 %v4771_v26, %v1617_v57 }
 0x51b   :  { %v1949_v62 = vld [vmem:[#allocation2 + $0xa8] sm:$0xff] }
 0x51c   :  { %v1692_v2 = vadd.f32 %v1691_v63, %v1548_v59  ;;  %v1700_v8 = vadd.f32 %v1699_v6, %v1618_v5  ;;  %v1718_v5 = vld [vmem:[%s5238_s1 + $0x28] sm:$0xff] }
 0x51d   :  { %vm1719_vm9 = vcmp.gt.f32.partialorder %v1718_v5, 0.5 }
 0x51e   :  { %v2940_v3 = vmul.f32 -1.442695, %v1692_v2  ;;  %v2941_v9 = vmul.f32 -1.442695, %v1700_v8 }
 0x520   :  { %4287 = vpow2.f32 %v2940_v3 }
 0x521   :  { %4289 = vpow2.f32 %v2941_v9 }
 0x529   :  { %v1687_v11 = vpop.f32.mrb[22].mxu1 }
 0x52a   :  { %v4288_v12 = vpop.eup %4287  ;;  %v3639_v14 = vpop.f32.mrb[23].mxu1  ;;  %v1688_v19 = vadd.f32 %v4779_v39, %v1687_v11 }
 0x52b   :  { %v1696_v15 = vadd.f32 1.0, %v4288_v12  ;;  %v4290_v18 = vpop.eup %4289 }
 0x52c   :  { %v1704_v23 = vadd.f32 1.0, %v4290_v18 }
 0x52d   :  { %4291 = vrcp.f32 %v1696_v15 }
 0x537   :  { %v4292_v20 = vpop.eup %4291 }
 0x538   :  { %v1708_v21 = vmul.f32 %v4292_v20, %v1688_v19  ;;  %v2175_v20 = vld [vmem:[#allocation2 + $0x30] sm:$0xff] }
 0x53a   :  { %v1709_v24 = vadd.f32 %v1708_v21, %v1707_v22 }
 0x53c   :  { %4293 = vtanh.f32 %v1709_v24 }
 0x53d   :  { %4295 = vrcp.f32 %v1704_v23  ;;  %v2183_v23 = vld [vmem:[#allocation2 + $0x70] sm:$0xff] }
 0x546   :  { %v4294_v25 = vpop.eup %4293 }
 0x547   :  { %v1711_v28 = vsub.f32 %v4931_v54, %v4294_v25  ;;  %v4296_v29 = vpop.eup %4295 }
 0x549   :  { %v1712_v30 = vmul.f32 %v4296_v29, %v1711_v28 }
 0x54b   :  { %v1713_v31 = vadd.f32 %v4294_v25, %v1712_v30 }
 0x54d   :  { %v1714_v32 = vsel %vm1477_vm8, %v1713_v31, 0.0  ;;  %v4979_v35 = vsel %vm1477_vm8, %v1713_v31, %v4931_v54 }
 0x54e   :  { %1715 = vst.msk [vmem:[#allocation3 + $0x20] sm:$0xff] %vm746_vm3, %v1714_v32  ;;  %3657 = vmatmul.mubr.msk.f32.vlgmr.msra.gmra.mrb[30].mxu0 %vm58_vm0, %v4979_v35  ;;  %3676 = vmatmul.mubr.msk.f32.vlgmr.msra.gmra.mrb[24].mxu1 %vm58_vm0, %v4979_v35 }
 0x54f   :  { %1716 = vst.msk [vmem:[#allocation3 + $0x18] sm:$0xff] %vm748_vm4, %v1714_v32  ;;  %4121 = vmatpush3.bf16.msra.mxu0 %v4630_v1  ;;  %3694 = vmatprep.mubr.msk.f32.mxu0 %vm4367_vm1, %v4368_v0  ;;  %v2191_v32 = vld [vmem:[#allocation2 + $0xb0] sm:$0xff] }
 0x550   :  { %4122 = vmatprep.subr.bf16.mxu0 %v4366_v34  ;;  %4133 = vmatpush3.bf16.msra.mxu1 %v4505_v33 }
 0x551   :  { %4134 = vmatprep.subr.bf16.mxu1 %v4366_v34  ;;  %3713 = vmatprep.mubr.msk.f32.mxu1 %vm4367_vm1, %v4368_v0 }
 0x553   :  { %4124 = vmatpush3.bf16.msra.mxu0 %v4655_v7 }
 0x554   :  { %4125 = vmatprep.subr.bf16.mxu0 %v4366_v34  ;;  %4136 = vmatpush3.bf16.msra.mxu1 %v4537_v42 }
 0x555   :  { %4137 = vmatprep.subr.bf16.mxu1 %v4366_v34 }
 0x557   :  { %4127 = vmatpush3.bf16.msra.mxu0 %v4681_v13 }
 0x558   :  { %4128 = vmatprep.subr.bf16.mxu0 %v4366_v34  ;;  %4139 = vmatpush3.bf16.msra.mxu1 %v4571_v50 }
 0x559   :  { %4140 = vmatprep.subr.bf16.mxu1 %v4366_v34 }
 0x55b   :  { %4130 = vmatpush3.bf16.msra.mxu0 %v4699_v17 }
 0x55c   :  { %4143 = vmatprep.subr.bf16.mxu0 %v4366_v34  ;;  %4142 = vmatpush3.bf16.msra.mxu1 %v4597_v56 }
 0x55d   :  { %4155 = vmatprep.subr.bf16.mxu1 %v4366_v34 }
 0x55e   :  { %3695 = vmatmul.mubr.msk.f32.vlgmr.msra.gmra.mrb[32].mxu0 %vm58_vm0, %v4979_v35 }
 0x55f   :  { %4145 = vmatpush3.bf16.msra.mxu0 %v4616_v61  ;;  %3732 = vmatprep.mubr.msk.f32.mxu0 %vm4367_vm1, %v4368_v0 }
 0x560   :  { %4146 = vmatprep.subr.bf16.mxu0 %v4366_v34 }
 0x563   :  { %4148 = vmatpush3.bf16.msra.mxu0 %v4643_v4 }
 0x564   :  { %4149 = vmatprep.subr.bf16.mxu0 %v4366_v34 }
 0x567   :  { %4151 = vmatpush3.bf16.msra.mxu0 %v4671_v10 }
 0x568   :  { %4152 = vmatprep.subr.bf16.mxu0 %v4366_v34 }
 0x56b   :  { %4154 = vmatpush3.bf16.msra.mxu0 %v4695_v16 }
 0x56c   :  { %4167 = vmatprep.subr.bf16.mxu0 %v4366_v34 }
 0x621   :  { %v1789_v36 = vpop.f32.mrb[30].mxu0  ;;  %v1859_v37 = vpop.f32.mrb[24].mxu1 }
 0x622   :  { %v1790_v38 = vadd.f32 %v4756_v58, %v1789_v36  ;;  %v3658_v40 = vpop.f32.mrb[31].mxu0  ;;  %v3677_v41 = vpop.f32.mrb[25].mxu1  ;;  %v1860_v46 = vadd.f32 %v4771_v26, %v1859_v37 }
 0x624   :  { %v1934_v44 = vadd.f32 %v1933_v43, %v1790_v38  ;;  %v1942_v48 = vadd.f32 %v1941_v47, %v1860_v46  ;;  %v1960_v38 = vld [vmem:[%s5238_s1 + $0x30] sm:$0xff]  ;;  %v2455_v47 = vld [vmem:[%s5239_s6 + $0x20] sm:$0xff] }
 0x625   :  { %vm1961_vm10 = vcmp.gt.f32.partialorder %v1960_v38, 0.5  ;;  %v2607_v38 = vld [vmem:[%s5240_s8 + $0x20] sm:$0xff] }
 0x626   :  { %v2945_v45 = vmul.f32 -1.442695, %v1934_v44  ;;  %v2946_v49 = vmul.f32 -1.442695, %v1942_v48  ;;  %v2456_v48 = vld [vmem:[%s5239_s6 + $0x28] sm:$0xff] }
 0x628   :  { %4297 = vpow2.f32 %v2945_v45 }
 0x629   :  { %4299 = vpow2.f32 %v2946_v49  ;;  %v4211_v49 = vpack.c.bf16 %v2456_v48, %v2455_v47 }
 0x631   :  { %v1929_v51 = vpop.f32.mrb[32].mxu0 }
 0x632   :  { %v4298_v52 = vpop.eup %4297  ;;  %v3696_v53 = vpop.f32.mrb[33].mxu0  ;;  %v1930_v57 = vadd.f32 %v4779_v39, %v1929_v51  ;;  %v2457_v51 = vld [vmem:[%s5239_s6 + $0x30] sm:$0xff] }
 0x633   :  { %v1938_v54 = vadd.f32 1.0, %v4298_v52  ;;  %v4300_v55 = vpop.eup %4299  ;;  %v2458_v52 = vld [vmem:[%s5239_s6 + $0x38] sm:$0xff] }
 0x634   :  { %v1946_v63 = vadd.f32 1.0, %v4300_v55  ;;  %v4215_v53 = vpack.c.bf16 %v2458_v52, %v2457_v51 }
 0x635   :  { %4301 = vrcp.f32 %v1938_v54 }
 0x63f   :  { %v4302_v59 = vpop.eup %4301 }
 0x640   :  { %v1950_v60 = vmul.f32 %v4302_v59, %v1930_v57  ;;  %v4365_v57 = vld [vmem:[%s5237_s5] ss:$0 sm:$0xff] }
 0x642   :  { %v1951_v2 = vadd.f32 %v1950_v60, %v1949_v62 }
 0x644   :  { %4303 = vtanh.f32 %v1951_v2 }
 0x645   :  { %4305 = vrcp.f32 %v1946_v63  ;;  %v2417_v63 = vld [vmem:[#allocation2 + $0x38] sm:$0xff] }
 0x64e   :  { %v4304_v3 = vpop.eup %4303 }
 0x64f   :  { %v1953_v6 = vsub.f32 %v4979_v35, %v4304_v3  ;;  %v4306_v8 = vpop.eup %4305 }
 0x651   :  { %v1954_v9 = vmul.f32 %v4306_v8, %v1953_v6  ;;  %v2425_v6 = vld [vmem:[#allocation2 + $0x78] sm:$0xff] }
 0x653   :  { %v1955_v11 = vadd.f32 %v4304_v3, %v1954_v9 }
 0x655   :  { %v1956_v12 = vsel %vm1719_vm9, %v1955_v11, 0.0  ;;  %v5027_v14 = vsel %vm1719_vm9, %v1955_v11, %v4979_v35 }
 0x656   :  { %1957 = vst.msk [vmem:[#allocation3 + $0x28] sm:$0xff] %vm746_vm3, %v1956_v12  ;;  %3714 = vmatmul.mubr.msk.f32.vlgmr.msra.gmra.mrb[26].mxu1 %vm58_vm0, %v5027_v14  ;;  %3733 = vmatmul.mubr.msk.f32.vlgmr.msra.gmra.mrb[34].mxu0 %vm58_vm0, %v5027_v14 }
 0x657   :  { %1958 = vst.msk [vmem:[#allocation3 + $0x10] sm:$0xff] %vm748_vm4, %v1956_v12  ;;  %4157 = vmatpush3.bf16.msra.mxu1 %v4630_v1  ;;  %3751 = vmatprep.mubr.msk.f32.mxu1 %vm4367_vm1, %v4368_v0 }
 0x658   :  { %4158 = vmatprep.subr.bf16.mxu1 %v4366_v34  ;;  %4169 = vmatpush3.bf16.msra.mxu0 %v4505_v33  ;;  %v5054_v33 = vld [vmem:[#allocation3 + $0x18] sm:$0xff] }
 0x659   :  { %4170 = vmatprep.subr.bf16.mxu0 %v4366_v34  ;;  %3770 = vmatprep.mubr.msk.f32.mxu0 %vm4367_vm1, %v4368_v0 }
 0x65b   :  { %4160 = vmatpush3.bf16.msra.mxu1 %v4655_v7 }
 0x65c   :  { %4161 = vmatprep.subr.bf16.mxu1 %v4366_v34  ;;  %4172 = vmatpush3.bf16.msra.mxu0 %v4537_v42 }
 0x65d   :  { %4173 = vmatprep.subr.bf16.mxu0 %v4366_v34  ;;  %v5062_v42 = vld [vmem:[#allocation3 + $0x28] sm:$0xff] }
 0x65e   :  { %v5046_v15 = vld [vmem:[#allocation3 + $0x10] sm:$0xff] }
 0x65f   :  { %2751 = vrot.lane.b32.xlu1 %v5046_v15, %s4369_s4  ;;  %4163 = vmatpush3.bf16.msra.mxu1 %v4681_v13 }
 0x660   :  { %4164 = vmatprep.subr.bf16.mxu1 %v4366_v34  ;;  %4175 = vmatpush3.bf16.msra.mxu0 %v4571_v50 }
 0x661   :  { %4176 = vmatprep.subr.bf16.mxu0 %v4366_v34 }
 0x663   :  { %2753 = vrot.lane.b32.xlu1 %v5054_v33, %s4369_s4  ;;  %4166 = vmatpush3.bf16.msra.mxu1 %v4699_v17 }
 0x664   :  { %4179 = vmatprep.subr.bf16.mxu1 %v4366_v34  ;;  %4178 = vmatpush3.bf16.msra.mxu0 %v4597_v56 }
 0x665   :  { %4191 = vmatprep.subr.bf16.mxu0 %v4366_v34 }
 0x666   :  { %3752 = vmatmul.mubr.msk.f32.vlgmr.msra.gmra.mrb[28].mxu1 %vm58_vm0, %v5027_v14 }
 0x667   :  { %2757 = vrot.lane.b32.xlu1 %v5062_v42, %s4369_s4  ;;  %4181 = vmatpush3.bf16.msra.mxu1 %v4616_v61 }
 0x668   :  { %3789 = vmatprep.mubr.msk.f32.mxu1 %vm4367_vm1, %v4368_v0  ;;  %4182 = vmatprep.subr.bf16.mxu1 %v4366_v34 }
 0x66b   :  { %4184 = vmatpush3.bf16.msra.mxu1 %v4643_v4 }
 0x66c   :  { %4185 = vmatprep.subr.bf16.mxu1 %v4366_v34 }
 0x66f   :  { %4187 = vmatpush3.bf16.msra.mxu1 %v4671_v10 }
 0x670   :  { %4188 = vmatprep.subr.bf16.mxu1 %v4366_v34 }
 0x673   :  { %4190 = vmatpush3.bf16.msra.mxu1 %v4695_v16 }
 0x729   :  { %v2031_v50 = vpop.f32.mrb[26].mxu1  ;;  %v2101_v56 = vpop.f32.mrb[34].mxu0 }
 0x72a   :  { %v2032_v18 = vadd.f32 %v4756_v58, %v2031_v50  ;;  %v3715_v61 = vpop.f32.mrb[27].mxu1  ;;  %v3734_v19 = vpop.f32.mrb[35].mxu0  ;;  %v2102_v4 = vadd.f32 %v4771_v26, %v2101_v56 }
 0x72c   :  { %v2176_v21 = vadd.f32 %v2175_v20, %v2032_v18  ;;  %v2184_v24 = vadd.f32 %v2183_v23, %v2102_v4  ;;  %v2433_v20 = vld [vmem:[#allocation2 + $0xb8] sm:$0xff] }
 0x72d   :  { %v2202_v4 = vld [vmem:[%s5238_s1 + $0x38] sm:$0xff] }
 0x72e   :  { %v2950_v22 = vmul.f32 -1.442695, %v2176_v21  ;;  %v2951_v25 = vmul.f32 -1.442695, %v2184_v24  ;;  %vm2203_vm11 = vcmp.gt.f32.partialorder %v2202_v4, 0.5 }
 0x730   :  { %4307 = vpow2.f32 %v2950_v22 }
 0x731   :  { %4309 = vpow2.f32 %v2951_v25 }
 0x739   :  { %v2171_v10 = vpop.f32.mrb[28].mxu1 }
 0x73a   :  { %v4308_v27 = vpop.eup %4307  ;;  %v3753_v28 = vpop.f32.mrb[29].mxu1  ;;  %v2172_v58 = vadd.f32 %v4779_v39, %v2171_v10 }
 0x73b   :  { %v2180_v29 = vadd.f32 1.0, %v4308_v27  ;;  %v4310_v16 = vpop.eup %4309 }
 0x73c   :  { %v2188_v35 = vadd.f32 1.0, %v4310_v16  ;;  %v5160_v16 = vld [vmem:[#allocation3 + $0x20] sm:$0xff] }
 0x73d   :  { %4311 = vrcp.f32 %v2180_v29 }
 0x747   :  { %v4312_v30 = vpop.eup %4311 }
 0x748   :  { %v2192_v31 = vmul.f32 %v4312_v30, %v2172_v58  ;;  %v2603_v30 = vld [vmem:[%s5240_s8] sm:$0xff] }
 0x74a   :  { %v2193_v36 = vadd.f32 %v2192_v31, %v2191_v32  ;;  %v2604_v31 = vld [vmem:[%s5240_s8 + $0x8] sm:$0xff] }
 0x74b   :  { %v4219_v32 = vpack.c.bf16 %v2604_v31, %v2603_v30 }
 0x74c   :  { %4313 = vtanh.f32 %v2193_v36  ;;  %v2606_v36 = vld [vmem:[%s5240_s8 + $0x18] sm:$0xff] }
 0x74d   :  { %4315 = vrcp.f32 %v2188_v35  ;;  %v2605_v35 = vld [vmem:[%s5240_s8 + $0x10] sm:$0xff] }
 0x756   :  { %v4314_v37 = vpop.eup %4313 }
 0x757   :  { %v2195_v40 = vsub.f32 %v5027_v14, %v4314_v37  ;;  %v4316_v41 = vpop.eup %4315 }
 0x759   :  { %v2196_v43 = vmul.f32 %v4316_v41, %v2195_v40  ;;  %v2608_v40 = vld [vmem:[%s5240_s8 + $0x28] sm:$0xff] }
 0x75a   :  { %v4227_v41 = vpack.c.bf16 %v2608_v40, %v2607_v38 }
 0x75b   :  { %v2197_v44 = vadd.f32 %v4314_v37, %v2196_v43  ;;  %v4223_v37 = vpack.c.bf16 %v2606_v36, %v2605_v35  ;;  %v2609_v43 = vld [vmem:[%s5240_s8 + $0x30] sm:$0xff] }
 0x75d   :  { %v2198_v45 = vsel %vm1961_vm10, %v2197_v44, 0.0  ;;  %v5086_v46 = vsel %vm1961_vm10, %v2197_v44, %v5027_v14  ;;  %v2610_v44 = vld [vmem:[%s5240_s8 + $0x38] sm:$0xff] }
 0x75e   :  { %2199 = vst.msk [vmem:[#allocation3 + $0x30] sm:$0xff] %vm746_vm3, %v2198_v45  ;;  %3771 = vmatmul.mubr.msk.f32.vlgmr.msra.gmra.mrb[36].mxu0 %vm58_vm0, %v5086_v46  ;;  %3790 = vmatmul.mubr.msk.f32.vlgmr.msra.gmra.mrb[30].mxu1 %vm58_vm0, %v5086_v46 }
 0x75f   :  { %2200 = vst.msk [vmem:[#allocation3 + $0x8] sm:$0xff] %vm748_vm4, %v2198_v45  ;;  %4193 = vmatpush3.bf16.msra.mxu0 %v4630_v1  ;;  %3808 = vmatprep.mubr.msk.f32.mxu0 %vm4367_vm1, %v4368_v0  ;;  %v2451_v1 = vld [vmem:[%s5239_s6] sm:$0xff]  ;;  %v2452_v0 = vld [vmem:[%s5239_s6 + $0x8] sm:$0xff]  ;;  %v4231_v45 = vpack.c.bf16 %v2610_v44, %v2609_v43 }
 0x760   :  { %4194 = vmatprep.subr.bf16.mxu0 %v4366_v34 }
 0x763   :  { %4196 = vmatpush3.bf16.msra.mxu0 %v4655_v7  ;;  %v4203_v7 = vpack.c.bf16 %v2452_v0, %v2451_v1 }
 0x764   :  { %4197 = vmatprep.subr.bf16.mxu0 %v4366_v34 }
 0x765   :  { %4204 = vmatprep.subr.bf16.mxu1 %v4203_v7  ;;  %v5168_v58 = vld [vmem:[#allocation3 + $0x30] sm:$0xff] }
 0x766   :  { %4206 = vmatpush3.bf16.msra.mxu1 %v4203_v7  ;;  %v5150_v29 = vld [vmem:[#allocation3 + $0x8] sm:$0xff] }
 0x767   :  { %4199 = vmatpush3.bf16.msra.mxu0 %v4681_v13  ;;  %v2454_v13 = vld [vmem:[%s5239_s6 + $0x18] sm:$0xff] }
 0x768   :  { %4200 = vmatprep.subr.bf16.mxu0 %v4366_v34  ;;  %v2453_v34 = vld [vmem:[%s5239_s6 + $0x10] sm:$0xff] }
 0x76b   :  { %4202 = vmatpush3.bf16.msra.mxu0 %v4699_v17  ;;  %v4207_v17 = vpack.c.bf16 %v2454_v13, %v2453_v34 }
 0x76c   :  { %4220 = vmatprep.subr.bf16.mxu0 %v4219_v32 }
 0x76d   :  { %4208 = vmatprep.subr.bf16.mxu1 %v4207_v17 }
 0x76e   :  { %3809 = vmatmul.mubr.msk.f32.vlgmr.msra.gmra.mrb[38].mxu0 %vm58_vm0, %v5086_v46  ;;  %4210 = vmatpush3.bf16.msra.mxu1 %v4207_v17 }
 0x76f   :  { %4212 = vmatprep.subr.bf16.mxu1 %v4211_v49  ;;  %4222 = vmatpush3.bf16.msra.mxu0 %v4219_v32 }
 0x770   :  { %4224 = vmatprep.subr.bf16.mxu0 %v4223_v37 }
 0x772   :  { %4214 = vmatpush3.bf16.msra.mxu1 %v4211_v49 }
 0x773   :  { %4216 = vmatprep.subr.bf16.mxu1 %v4215_v53  ;;  %4226 = vmatpush3.bf16.msra.mxu0 %v4223_v37 }
 0x774   :  { %4228 = vmatprep.subr.bf16.mxu0 %v4227_v41 }
 0x776   :  { %4218 = vmatpush3.bf16.msra.mxu1 %v4215_v53 }
 0x777   :  { %4235 = vmatprep.subr.bf16.mxu1 %v4219_v32  ;;  %4230 = vmatpush3.bf16.msra.mxu0 %v4227_v41 }
 0x778   :  { %4232 = vmatprep.subr.bf16.mxu0 %v4231_v45 }
 0x77b   :  { %4234 = vmatpush3.bf16.msra.mxu0 %v4231_v45 }
 0x831   :  { %v2273_v54 = vpop.f32.mrb[36].mxu0  ;;  %v2343_v55 = vpop.f32.mrb[30].mxu1 }
 0x832   :  { %v2274_v59 = vadd.f32 %v4365_v57, %v2273_v54  ;;  %v3772_v60 = vpop.f32.mrb[37].mxu0  ;;  %v3791_v62 = vpop.f32.mrb[31].mxu1  ;;  %v2344_v5 = vadd.f32 %v4771_v26, %v2343_v55 }
 0x834   :  { %v2418_v2 = vadd.f32 %v2417_v63, %v2274_v59  ;;  %v2426_v8 = vadd.f32 %v2425_v6, %v2344_v5 }
 0x836   :  { %v2955_v3 = vmul.f32 -1.442695, %v2418_v2  ;;  %v2956_v9 = vmul.f32 -1.442695, %v2426_v8 }
 0x838   :  { %4317 = vpow2.f32 %v2955_v3 }
 0x839   :  { %4319 = vpow2.f32 %v2956_v9  ;;  %v2966_v9 = vld [vmem:[%s5242_s9] ss:$0 sm:$0xff] }
 0x841   :  { %v2413_v11 = vpop.f32.mrb[38].mxu0 }
 0x842   :  { %v4318_v12 = vpop.eup %4317  ;;  %v3810_v14 = vpop.f32.mrb[39].mxu0  ;;  %v2414_v18 = vadd.f32 %v4779_v39, %v2413_v11 }
 0x843   :  { %v2422_v50 = vadd.f32 1.0, %v4318_v12  ;;  %v4320_v56 = vpop.eup %4319 }
 0x844   :  { %v2430_v21 = vadd.f32 1.0, %v4320_v56 }
 0x845   :  { %4321 = vrcp.f32 %v2422_v50 }
 0x84f   :  { %v4322_v61 = vpop.eup %4321 }
 0x850   :  { %v2434_v19 = vmul.f32 %v4322_v61, %v2414_v18 }
 0x852   :  { %v2435_v22 = vadd.f32 %v2434_v19, %v2433_v20 }
 0x854   :  { %4323 = vtanh.f32 %v2435_v22 }
 0x855   :  { %4325 = vrcp.f32 %v2430_v21 }
 0x85e   :  { %v4324_v26 = vpop.eup %4323 }
 0x85f   :  { %v2437_v23 = vsub.f32 %v5086_v46, %v4324_v26  ;;  %v4326_v24 = vpop.eup %4325  ;;  %v2957_v46 = vld [vmem:[%s5241_s7] ss:$0 sm:$0xff] }
 0x861   :  { %v2438_v25 = vmul.f32 %v4326_v24, %v2437_v23 }
 0x863   :  { %v2439_v10 = vadd.f32 %v4324_v26, %v2438_v25 }
 0x865   :  { %v2440_v27 = vsel %vm2203_vm11, %v2439_v10, 0.0 }
 0x866   :  { %2441 = vst.msk [vmem:[#allocation3 + $0x38] sm:$0xff] %vm746_vm3, %v2440_v27 }
 0x867   :  { %2442 = vst.msk [vmem:[#allocation3] sm:$0xff] %vm748_vm4, %v2440_v27 }
 0x86d   :  { %v5140_v39 = vld [vmem:[#allocation3 + $0x38] sm:$0xff] }
 0x86e   :  { %v5142_v28 = vld [vmem:[#allocation3] sm:$0xff]  ;;  %2761 = vrot.lane.b32.xlu1 %v5140_v39, %s4369_s4 }
 0x86f   :  { %2747 = vrot.lane.b32.xlu0 %v5142_v28, %s4369_s4  ;;  %3827 = vmatprep.mubr.msk.f32.mxu1 %vm58_vm0, %v5142_v28 }
 0x870   :  { %3828 = vmatmul.mubr.msk.f32.vlgmr.msra.gmra.mrb[32].mxu1 %vm58_vm0, %v5150_v29 }
 0x871   :  { %3830 = vmatprep.mubr.msk.f32.mxu1 %vm58_vm0, %v5046_v15  ;;  %4239 = vmatpush3.bf16.msra.mxu1 %v4219_v32 }
 0x872   :  { %4236 = vmatprep.subr.bf16.mxu1 %v4223_v37 }
 0x873   :  { %2749 = vrot.lane.b32.xlu0 %v5150_v29, %s4369_s4 }
 0x874   :  { %3831 = vmatmul.mubr.msk.f32.gmra.mrb[34].mxu1 %vm58_vm0, %v5054_v33 }
 0x875   :  { %3833 = vmatprep.mubr.msk.f32.mxu1 %vm58_vm0, %v5160_v16  ;;  %4240 = vmatpush3.bf16.msra.mxu1 %v4223_v37 }
 0x876   :  { %4237 = vmatprep.subr.bf16.mxu1 %v4227_v41 }
 0x877   :  { %2755 = vrot.lane.b32.xlu0 %v5160_v16, %s4369_s4 }
 0x878   :  { %3834 = vmatmul.mubr.msk.f32.gmra.mrb[36].mxu1 %vm58_vm0, %v5062_v42 }
 0x879   :  { %3836 = vmatprep.mubr.msk.f32.mxu1 %vm58_vm0, %v5168_v58  ;;  %4241 = vmatpush3.bf16.msra.mxu1 %v4227_v41 }
 0x87a   :  { %4238 = vmatprep.subr.bf16.mxu1 %v4231_v45 }
 0x87b   :  { %2759 = vrot.lane.b32.xlu0 %v5168_v58, %s4369_s4 }
 0x87c   :  { %3837 = vmatmul.mubr.msk.f32.gmra.mrb[38].mxu1 %vm58_vm0, %v5140_v39 }
 0x87d   :  { %4242 = vmatpush3.bf16.msra.mxu1 %v4231_v45 }
 0x943   :  { %v3829_v1 = vpop.f32.mrb[32].mxu1 }
 0x944   :  { %v2562_v0 = vadd.f32 %v3829_v1, %v2957_v46  ;;  %v2556_v7 = vpop.f32.mrb[33].mxu1 }
 0x945   :  { %v2557_v34 = vadd.f32 %v2957_v46, %v2556_v7 }
 0x947   :  { %4327 = vtanh.f32 %v2557_v34  ;;  %v3832_v13 = vpop.f32.mrb[34].mxu1 }
 0x948   :  { %4329 = vtanh.f32 %v2562_v0  ;;  %v2572_v17 = vadd.f32 %v3832_v13, %v2957_v46  ;;  %v2566_v47 = vpop.f32.mrb[35].mxu1  ;;  %v2748_v13 = vpop.permute.xlu0 %2747 }
 0x949   :  { %v2567_v48 = vadd.f32 %v2957_v46, %v2566_v47 }
 0x94b   :  { %4331 = vtanh.f32 %v2567_v48  ;;  %v3835_v49 = vpop.f32.mrb[36].mxu1  ;;  %v2752_v48 = vpop.permute.xlu1 %2751 }
 0x94c   :  { %4333 = vtanh.f32 %v2572_v17  ;;  %v2582_v51 = vadd.f32 %v3835_v49, %v2957_v46  ;;  %v2576_v52 = vpop.f32.mrb[37].mxu1 }
 0x94d   :  { %v2577_v53 = vadd.f32 %v2957_v46, %v2576_v52 }
 0x94f   :  { %4335 = vtanh.f32 %v2577_v53  ;;  %v3838_v54 = vpop.f32.mrb[38].mxu1 }
 0x950   :  { %4337 = vtanh.f32 %v2582_v51  ;;  %v2592_v55 = vadd.f32 %v3838_v54, %v2957_v46  ;;  %v2586_v57 = vpop.f32.mrb[39].mxu1  ;;  %v2750_v51 = vpop.permute.xlu0 %2749 }
 0x951   :  { %v4328_v59 = vpop.eup %4327  ;;  %v2587_v60 = vadd.f32 %v2957_v46, %v2586_v57  ;;  %v2754_v54 = vpop.permute.xlu1 %2753 }
 0x952   :  { %v4330_v62 = vpop.eup %4329  ;;  %3855 = vmatprep.mubr.msk.f32.mxu0 %vm58_vm0, %v4328_v59  ;;  %v2772_v59 = vsel %vm58_vm0, %v5150_v29, %v2750_v51 }
 0x953   :  { %4339 = vtanh.f32 %v2587_v60  ;;  %3856 = vmatmul.mubr.msk.f32.vlgmr.msra.gmra.mrb[40].mxu0 %vm58_vm0, %v4330_v62 }
 0x954   :  { %4341 = vtanh.f32 %v2592_v55  ;;  %v2771_v55 = vsel %vm58_vm0, %v5142_v28, %v2748_v13  ;;  %v2774_v28 = vsel %vm58_vm0, %v5054_v33, %v2754_v54 }
 0x955   :  { %v4332_v63 = vpop.eup %4331 }
 0x956   :  { %v4334_v2 = vpop.eup %4333  ;;  %3858 = vmatprep.mubr.msk.f32.mxu0 %vm58_vm0, %v4332_v63  ;;  %v2756_v63 = vpop.permute.xlu0 %2755 }
 0x957   :  { %3859 = vmatmul.mubr.msk.f32.gmra.mrb[42].mxu0 %vm58_vm0, %v4334_v2 }
 0x959   :  { %v4336_v3 = vpop.eup %4335 }
 0x95a   :  { %v4338_v5 = vpop.eup %4337  ;;  %3861 = vmatprep.mubr.msk.f32.mxu1 %vm58_vm0, %v4336_v3 }
 0x95b   :  { %3862 = vmatmul.mubr.msk.f32.vlgmr.msra.gmra.mrb[40].mxu1 %vm58_vm0, %v4338_v5 }
 0x95d   :  { %v4340_v6 = vpop.eup %4339 }
 0x95e   :  { %v4342_v8 = vpop.eup %4341  ;;  %3864 = vmatprep.mubr.msk.f32.mxu1 %vm58_vm0, %v4340_v6  ;;  %v2773_v6 = vsel %vm58_vm0, %v5046_v15, %v2752_v48 }
 0x95f   :  { %3865 = vmatmul.mubr.msk.f32.gmra.mrb[42].mxu1 %vm58_vm0, %v4342_v8 }
 0xa26   :  { %v3857_v11 = vpop.f32.mrb[40].mxu0 }
 0xa27   :  { %v2714_v12 = vadd.f32 %v3857_v11, %v2966_v9  ;;  %v2708_v14 = vpop.f32.mrb[41].mxu0 }
 0xa28   :  { %v2709_v50 = vadd.f32 %v2966_v9, %v2708_v14  ;;  %v2758_v14 = vpop.permute.xlu1 %2757 }
 0xa2a   :  { %v2779_v56 = vmax.f32 %v2709_v50, %v2714_v12  ;;  %v3860_v18 = vpop.f32.mrb[42].mxu0 }
 0xa2b   :  { %v2718_v61 = vpop.f32.mrb[43].mxu0  ;;  %v2724_v20 = vadd.f32 %v3860_v18, %v2966_v9 }
 0xa2c   :  { %v2719_v19 = vadd.f32 %v2966_v9, %v2718_v61  ;;  %v2775_v61 = vsel %vm58_vm0, %v5160_v16, %v2756_v63 }
 0xa2e   :  { %v2780_v21 = vmax.f32 %v2779_v56, %v2719_v19  ;;  %v3863_v22 = vpop.f32.mrb[40].mxu1 }
 0xa2f   :  { %v2728_v26 = vpop.f32.mrb[41].mxu1  ;;  %v2734_v24 = vadd.f32 %v3863_v22, %v2966_v9 }
 0xa30   :  { %v2729_v4 = vadd.f32 %v2966_v9, %v2728_v26  ;;  %v2781_v23 = vmax.f32 %v2780_v21, %v2724_v20  ;;  %v2776_v26 = vsel %vm58_vm0, %v5062_v42, %v2758_v14 }
 0xa32   :  { %v2782_v25 = vmax.f32 %v2781_v23, %v2729_v4  ;;  %v3866_v10 = vpop.f32.mrb[42].mxu1 }
 0xa33   :  { %v2738_v27 = vpop.f32.mrb[43].mxu1  ;;  %v2744_v32 = vadd.f32 %v3866_v10, %v2966_v9 }
 0xa34   :  { %v2739_v30 = vadd.f32 %v2966_v9, %v2738_v27  ;;  %v2783_v31 = vmax.f32 %v2782_v25, %v2734_v24 }
 0xa36   :  { %v2784_v35 = vmax.f32 %v2783_v31, %v2739_v30 }
 0xa38   :  { %v2785_v36 = vmax.f32 %v2784_v35, %v2744_v32 }
 0xa3a   :  { %v2786_v37 = vsub.f32 %v2709_v50, %v2785_v36  ;;  %v2792_v38 = vsub.f32 %v2714_v12, %v2785_v36  ;;  %v2798_v40 = vsub.f32 %v2719_v19, %v2785_v36  ;;  %v2804_v41 = vsub.f32 %v2724_v20, %v2785_v36  ;;  %v2760_v19 = vpop.permute.xlu0 %2759 }
 0xa3b   :  { %v2810_v43 = vsub.f32 %v2729_v4, %v2785_v36  ;;  %v2816_v44 = vsub.f32 %v2734_v24, %v2785_v36  ;;  %v2822_v45 = vsub.f32 %v2739_v30, %v2785_v36  ;;  %v2828_v46 = vsub.f32 %v2744_v32, %v2785_v36  ;;  %v2762_v4 = vpop.permute.xlu1 %2761 }
 0xa3c   :  { %v2787_v1 = vmul.f32 1.442695, %v2786_v37  ;;  %v2793_v0 = vmul.f32 1.442695, %v2792_v38  ;;  %v2799_v7 = vmul.f32 1.442695, %v2798_v40  ;;  %v2777_v10 = vsel %vm58_vm0, %v5168_v58, %v2760_v19 }
 0xa3d   :  { %v2805_v34 = vmul.f32 1.442695, %v2804_v41  ;;  %v2811_v17 = vmul.f32 1.442695, %v2810_v43  ;;  %v2817_v47 = vmul.f32 1.442695, %v2816_v44  ;;  %v2778_v16 = vsel %vm58_vm0, %v5140_v39, %v2762_v4 }
 0xa3e   :  { %4343 = vpow2.f32 %v2787_v1  ;;  %v2823_v49 = vmul.f32 1.442695, %v2822_v45  ;;  %v2829_v52 = vmul.f32 1.442695, %v2828_v46 }
 0xa3f   :  { %4345 = vpow2.f32 %v2793_v0 }
 0xa40   :  { %4347 = vpow2.f32 %v2799_v7 }
 0xa41   :  { %4349 = vpow2.f32 %v2805_v34 }
 0xa42   :  { %4351 = vpow2.f32 %v2811_v17 }
 0xa43   :  { %4353 = vpow2.f32 %v2817_v47 }
 0xa44   :  { %4355 = vpow2.f32 %v2823_v49 }
 0xa45   :  { %4357 = vpow2.f32 %v2829_v52 }
 0xa48   :  { %v4344_v53 = vpop.eup %4343 }
 0xa49   :  { %v4346_v57 = vpop.eup %4345  ;;  %v2790_v60 = vmul.f32 %v4344_v53, %v2771_v55 }
 0xa4a   :  { %v4348_v62 = vpop.eup %4347  ;;  %v2795_v2 = vadd.f32 %v4346_v57, %v4344_v53  ;;  %v2796_v3 = vmul.f32 %v4346_v57, %v2772_v59 }
 0xa4b   :  { %v4350_v5 = vpop.eup %4349  ;;  %v2802_v11 = vmul.f32 %v4348_v62, %v2773_v6 }
 0xa4c   :  { %v2801_v8 = vadd.f32 %v4348_v62, %v2795_v2  ;;  %v2797_v9 = vadd.f32 %v2796_v3, %v2790_v60  ;;  %v4352_v12 = vpop.eup %4351  ;;  %v2808_v56 = vmul.f32 %v4350_v5, %v2774_v28 }
 0xa4d   :  { %v4354_v18 = vpop.eup %4353  ;;  %v2814_v22 = vmul.f32 %v4352_v12, %v2775_v61 }
 0xa4e   :  { %v2807_v50 = vadd.f32 %v4350_v5, %v2801_v8  ;;  %v2803_v29 = vadd.f32 %v2802_v11, %v2797_v9  ;;  %v4356_v15 = vpop.eup %4355  ;;  %v2820_v33 = vmul.f32 %v4354_v18, %v2776_v26 }
 0xa4f   :  { %v4358_v25 = vpop.eup %4357  ;;  %v2826_v31 = vmul.f32 %v4356_v15, %v2777_v10 }
 0xa50   :  { %v2813_v20 = vadd.f32 %v4352_v12, %v2807_v50  ;;  %v2809_v21 = vadd.f32 %v2808_v56, %v2803_v29  ;;  %v2832_v36 = vmul.f32 %v4358_v25, %v2778_v16 }
 0xa52   :  { %v2819_v23 = vadd.f32 %v4354_v18, %v2813_v20  ;;  %v2815_v24 = vadd.f32 %v2814_v22, %v2809_v21 }
 0xa54   :  { %v2825_v27 = vadd.f32 %v4356_v15, %v2819_v23  ;;  %v2821_v30 = vadd.f32 %v2820_v33, %v2815_v24 }
 0xa56   :  { %v2827_v32 = vadd.f32 %v2826_v31, %v2821_v30  ;;  %v2831_v35 = vadd.f32 %v4358_v25, %v2825_v27 }
 0xa58   :  { %v2833_v37 = vadd.f32 %v2832_v36, %v2827_v32  ;;  %4359 = vrcp.f32 %v2831_v35 }
 0xa62   :  { %v4360_v42 = vpop.eup %4359 }
 0xa63   :  { %v2835_v38 = vmul.f32 %v4360_v42, %v2833_v37 }
 0xa65   :  { %v2836_v40 = vmul.f32 %v2835_v38, %v2835_v38 }
 0xa67   :  { %2837 = vadd.xlane.f32.xlu0 %v2836_v40 }
 0xaf4   :  { %v2838_v41 = vpop.xlane.xlu0 %2837 }
 0xaf5   :  { %4361 = vrsqrt.f32 %v2838_v41  ;;  %vm2841_vm12 = vcmp.eq.f32.partialorder %v2838_v41, inf  ;;  %v2844_v58 = vand.u32 2147483648, %v2838_v41  ;;  %vm2843_vm13 = vcmp.eq.f32.partialorder %v2838_v41, 0.0 }
 0xaff   :  { %v4362_v43 = vpop.eup %4361 }
 0xb00   :  { %v2840_v44 = vmul.f32 %v4362_v43, %v2838_v41 }
 0xb02   :  { %v2842_v45 = vsel %vm2841_vm12, %v2838_v41, %v2840_v44 }
 0xb03   :  { %v2845_v46 = vsel %vm2843_vm13, %v2844_v58, %v2842_v45 }
 0xb04   :  { %v2846_v1 = vmax.f32 %v2845_v46, 1e-12 }
 0xb06   :  { %4363 = vrcp.f32 %v2846_v1 }
 0xb10   :  { %v4364_v39 = vpop.eup %4363 }
 0xb11   :  { %v2848_v0 = vmul.f32 %v4364_v39, %v2835_v38 }
 0xb13   :  { %2849 = vst [vmem:[%s5243_s10] sm:$0xff] %v2848_v0 }

</bundles_post_ra>
